<compile_context>
chip_gen: v7x
topology: tpu7x:2x2x1
jax: 0.10.0
libtpu: 0.0.40
codegen_flags: <defaults>
</compile_context>

<pallas_src>
import jax
import jax.numpy as jnp
from jax import lax
from jax.experimental import pallas as pl
from jax.experimental.pallas import tpu as pltpu

IN_FEATURES = 196608   # fixed by the module definition
OUT_FEATURES = 10
LANES = 128
SUBLANE_CHUNK = 64     # K-sublanes processed per inner-loop iteration (keeps live vregs small)


def _chip_parallelism():
    """Best-effort (num_core_splits, first-axis dimension_semantics) for this chip."""
    try:
        kind = jax.devices()[0].device_kind.lower().replace(" ", "")
    except Exception:
        return 1, "arbitrary"
    if "v7" in kind or "7x" in kind:
        # v7x: 2 TensorCores per chip -> shard the K stream across both cores.
        return 2, getattr(pltpu, "CORE_PARALLEL", "parallel")
    if "v4" in kind or "v5p" in kind:
        # Megacore chips: classic "parallel" leading axis.
        return 2, "parallel"
    # v2/v3/v5e/v6e: one TensorCore per JAX device -> no split, no partials slab.
    return 1, "arbitrary"


def _linear_kernel(x_ref, w_ref, b_ref, o_ref, acc_ref):
    """One (core-split, K-step) grid point of y = x @ W^T + b.

    x_ref:   (B, Cblk, 128) f32   lane-dense K slice of the input
    w_ref:   (N, Cblk, 128) bf16  lane-dense K slice of the weight
    b_ref:   (1, N)         f32   bias (added once: core-split 0, last K step)
    o_ref:   (B, N)         f32   output block (constant across the K axis)
    acc_ref: (N, B, 128)    f32   per-lane partial sums, persistent across K steps
    """
    c = pl.program_id(0)
    k = pl.program_id(1)
    n_feat, c_blk, _ = w_ref.shape

    @pl.when(k == 0)
    def _init():
        acc_ref[...] = jnp.zeros_like(acc_ref)

    # VPU multiply-accumulate (no MXU: stationary-weight reloads for this shape
    # would dominate).  The chunked inner loop keeps live intermediates to a
    # handful of vregs instead of materialising the full (B, Cblk, 128) product.
    num_chunks = c_blk // SUBLANE_CHUNK

    def body(i, carry):
        off = pl.multiple_of(i * SUBLANE_CHUNK, SUBLANE_CHUNK)
        xs = x_ref[:, pl.ds(off, SUBLANE_CHUNK), :]                    # (B, CHUNK, 128) f32
        for n in range(n_feat):                                        # N = 10, static unroll
            wn = w_ref[n, pl.ds(off, SUBLANE_CHUNK), :].astype(jnp.float32)  # (CHUNK, 128)
            # per-lane partial sums for feature n (reduce over the CHUNK sublanes)
            acc_ref[n] += jnp.sum(xs * wn[None, :, :], axis=1)         # (B, 128)
        return carry

    lax.fori_loop(0, num_chunks, body, 0)

    @pl.when(k == pl.num_programs(1) - 1)
    def _finalize():
        totals = jnp.sum(acc_ref[...], axis=-1)                        # (N, B) cross-lane reduce
        bias = jnp.where(c == 0, b_ref[...], jnp.zeros_like(b_ref[...]))  # (1, N), once overall
        o_ref[...] = (totals.T + bias).astype(o_ref.dtype)             # (B, N)


def linear_pallas(x, w_packed, bias, *, num_core_splits=None, steps_per_split=2,
                  core_semantics=None):
    """x: [B, K] f32, w_packed: [N, K//128, 128] (bf16 or f32), bias: [N] -> [B, N]."""
    B, K = x.shape
    N, c_total, lanes = w_packed.shape
    assert lanes == LANES and c_total * LANES == K, "weight must be packed as (N, K//128, 128)"
    assert bias.shape == (N,)

    if num_core_splits is None or core_semantics is None:
        det_splits, det_sem = _chip_parallelism()
        if num_core_splits is None:
            num_core_splits = det_splits
        if core_semantics is None:
            core_semantics = det_sem if num_core_splits > 1 else "arbitrary"

    total_blocks = num_core_splits * steps_per_split
    assert c_total % total_blocks == 0, "K/128 must divide evenly into the grid"
    c_blk = c_total // total_blocks
    assert c_blk % SUBLANE_CHUNK == 0

    # Lane-dense activation slab (free-ish relayout; enables fully dense DMA + vregs).
    x3 = x.reshape(B, c_total, LANES)
    bias2 = bias.reshape(1, N).astype(jnp.float32)

    in_specs = [
        pl.BlockSpec((B, c_blk, LANES), lambda c, k: (0, c * steps_per_split + k, 0)),
        pl.BlockSpec((N, c_blk, LANES), lambda c, k: (0, c * steps_per_split + k, 0)),
        pl.BlockSpec((1, N), lambda c, k: (0, 0)),
    ]

    if num_core_splits == 1:
        # Single TensorCore: output is final, bias already added in-kernel -> no epilogue.
        out_shape = jax.ShapeDtypeStruct((B, N), jnp.float32)
        out_specs = pl.BlockSpec((B, N), lambda c, k: (0, 0))
    else:
        # One partial slab per core (no cross-core write race); wrapper sums 2x(B,N).
        out_shape = jax.ShapeDtypeStruct((num_core_splits, B, N), jnp.float32)
        out_specs = pl.BlockSpec((None, B, N), lambda c, k: (c, 0, 0))

    bytes_accessed = int(
        x3.size * x3.dtype.itemsize
        + w_packed.size * w_packed.dtype.itemsize
        + bias2.size * 4
        + B * N * 4
    )
    cost = pl.CostEstimate(flops=2 * B * N * K, transcendentals=0,
                           bytes_accessed=bytes_accessed)

    arb = getattr(pltpu, "ARBITRARY", "arbitrary")
    out = pl.pallas_call(
        _linear_kernel,
        out_shape=out_shape,
        grid_spec=pltpu.PrefetchScalarGridSpec(
            num_scalar_prefetch=0,
            grid=(num_core_splits, steps_per_split),
            in_specs=in_specs,
            out_specs=out_specs,
            scratch_shapes=[pltpu.VMEM((N, B, LANES), jnp.float32)],
        ),
        compiler_params=pltpu.CompilerParams(
            dimension_semantics=(core_semantics, arb),
        ),
        cost_estimate=cost,
    )(x3, w_packed, bias2)

    if num_core_splits == 1:
        return out.astype(x.dtype)
    return out.sum(axis=0).astype(x.dtype)


class MyModulePallas:
    """JAX/Pallas equivalent of the PyTorch MyModule (Linear(196608, 10)).

    The f32 master weight is kept (PyTorch semantics); the copy streamed by the
    kernel is repacked once, at construction, into a lane-dense
    (N, K//128, 128) slab and stored as bfloat16 by default (accumulation is
    f32).  Set weight_dtype=jnp.float32 for bit-faithful f32 weights.
    """

    def __init__(self, key, *, weight_dtype=jnp.bfloat16):
        kw, kb = jax.random.split(key)
        bound = 1.0 / (IN_FEATURES ** 0.5)
        # nn.Linear-style uniform(-1/sqrt(K), 1/sqrt(K)); PyTorch [N, K] layout.
        self.weight = jax.random.uniform(
            kw, (OUT_FEATURES, IN_FEATURES), jnp.float32, -bound, bound)
        self.bias = jax.random.uniform(
            kb, (OUT_FEATURES,), jnp.float32, -bound, bound)
        # One-time repack: lane-dense, (optionally) bf16 weight used by the kernel.
        self.weight_packed = self.weight.astype(weight_dtype).reshape(
            OUT_FEATURES, IN_FEATURES // LANES, LANES)
        self._forward = jax.jit(linear_pallas)

    def __call__(self, x):
        return self._forward(x, self.weight_packed, self.bias)


if __name__ == "__main__":
    key = jax.random.PRNGKey(0)
    k_param, k_x = jax.random.split(key)

    module = MyModulePallas(k_param)

    # Small batch; the feature dim (196608) is fixed by the module definition.
    B = 2
    x = jax.random.normal(k_x, (B, IN_FEATURES), dtype=jnp.float32)

    out = jax.block_until_ready(module(x))
    assert out.shape == (B, OUT_FEATURES), out.shape

    # Reference 1: exactly the math the kernel performs (bf16-stored weight,
    # f32 accumulation) -> validates tiling / accumulation at tight tolerance.
    w_used = module.weight_packed.reshape(OUT_FEATURES, IN_FEATURES).astype(jnp.float32)
    ref_same_weights = x @ w_used.T + module.bias
    assert jnp.allclose(out, ref_same_weights, atol=1e-3, rtol=1e-3), "kernel mismatch"

    # Reference 2: original f32 Linear semantics; the only difference is the
    # bf16 weight quantisation, so use a correspondingly looser tolerance.
    ref_f32 = x @ module.weight.T + module.bias
    assert jnp.allclose(out, ref_f32, atol=2e-2, rtol=2e-2), "bf16 weight drift too large"

    print("KERNEL_OK")
</pallas_src>

<mosaic_0001>
module attributes {stable_mosaic.version = 11 : i64} {
  func.func @_linear_kernel(%arg0: i32, %arg1: i32, %arg2: memref<2x768x128xf32, #tpu.memory_space<vmem>>, %arg3: memref<10x768x128xbf16, #tpu.memory_space<vmem>>, %arg4: memref<1x10xf32, #tpu.memory_space<vmem>>, %arg5: memref<2x10xf32, #tpu.memory_space<vmem>>, %arg6: memref<10x2x128xf32, #tpu.memory_space<vmem>>) attributes {dimension_semantics = [#tpu.dimension_semantics<arbitrary>, #tpu.dimension_semantics<arbitrary>], iteration_bounds = array<i64: 1, 2>, scalar_prefetch = 0 : i64, scratch_operands = 1 : i64, tpu.core_type = #tpu.core_type<tc>, window_params = [{transform_indices = @transform_0, window_bounds = array<i64: 2, 768, 128>}, {transform_indices = @transform_1, window_bounds = array<i64: 10, 768, 128>}, {pipeline_mode = #tpu.pipeline_mode<synchronous>, transform_indices = @transform_2, window_bounds = array<i64: 1, 10>}, {pipeline_mode = #tpu.pipeline_mode<synchronous>, transform_indices = @transform_3, window_bounds = array<i64: 2, 10>}]} {
    %c0_i32 = arith.constant 0 : i32
    %0 = arith.cmpi eq, %arg1, %c0_i32 : i32
    %1 = arith.extui %0 : i1 to i32
    %c0_i32_0 = arith.constant 0 : i32
    %2 = arith.cmpi ne, %1, %c0_i32_0 : i32
    scf.if %2 {
      %cst = arith.constant 0.000000e+00 : f32
      %7 = vector.broadcast %cst : f32 to vector<10x2x128xf32>
      %c0 = arith.constant 0 : index
      %c0_5 = arith.constant 0 : index
      %c0_6 = arith.constant 0 : index
      %8 = vector.load %arg6[%c0, %c0_5, %c0_6] : memref<10x2x128xf32, #tpu.memory_space<vmem>>, vector<10x2x128xf32>
      tpu.vector_store %arg6[%c0, %c0_5, %c0_6], %7 {strides = array<i32>} : memref<10x2x128xf32, #tpu.memory_space<vmem>>, vector<10x2x128xf32>,
    } else {
    }
    %c0_i32_1 = arith.constant 0 : i32
    %c12_i32 = arith.constant 12 : i32
    %3 = arith.addi %c0_i32_1, %c12_i32 : i32
    %c1_i32 = arith.constant 1 : i32
    scf.for %arg7 = %c0_i32_1 to %3 step %c1_i32  : i32 {
      %c64_i32 = arith.constant 64 : i32
      %7 = arith.muli %arg7, %c64_i32 : i32
      %8 = tpu.assume_multiple %7, 64 : i32
      %c0 = arith.constant 0 : index
      %9 = arith.index_cast %8 : i32 to index
      %c0_5 = arith.constant 0 : index
      %10 = vector.load %arg2[%c0, %9, %c0_5] : memref<2x768x128xf32, #tpu.memory_space<vmem>>, vector<2x64x128xf32>
      %c0_6 = arith.constant 0 : index
      %11 = arith.index_cast %8 : i32 to index
      %c0_7 = arith.constant 0 : index
      %12 = vector.load %arg3[%c0_6, %11, %c0_7] : memref<10x768x128xbf16, #tpu.memory_space<vmem>>, vector<1x64x128xbf16>
      %13 = vector.shape_cast %12 : vector<1x64x128xbf16> to vector<64x128xbf16>
      %14 = arith.extf %13 : vector<64x128xbf16> to vector<64x128xf32>
      %c0_8 = arith.constant 0 : index
      %c0_9 = arith.constant 0 : index
      %c0_10 = arith.constant 0 : index
      %15 = vector.load %arg6[%c0_8, %c0_9, %c0_10] : memref<10x2x128xf32, #tpu.memory_space<vmem>>, vector<1x2x128xf32>
      %16 = vector.shape_cast %15 : vector<1x2x128xf32> to vector<2x128xf32>
      %17 = vector.shape_cast %14 : vector<64x128xf32> to vector<1x64x128xf32>
      %18 = vector.broadcast %17 : vector<1x64x128xf32> to vector<2x64x128xf32>
      %19 = arith.mulf %10, %18 : vector<2x64x128xf32>
      %cst = arith.constant dense<0.000000e+00> : vector<2x128xf32>
      %20 = vector.multi_reduction <add>, %19, %cst [1] : vector<2x64x128xf32> to vector<2x128xf32>
      %21 = arith.addf %16, %20 : vector<2x128xf32>
      %c0_11 = arith.constant 0 : index
      %c0_12 = arith.constant 0 : index
      %c0_13 = arith.constant 0 : index
      %22 = vector.load %arg6[%c0_11, %c0_12, %c0_13] : memref<10x2x128xf32, #tpu.memory_space<vmem>>, vector<1x2x128xf32>
      %23 = vector.shape_cast %22 : vector<1x2x128xf32> to vector<2x128xf32>
      %24 = vector.shape_cast %21 : vector<2x128xf32> to vector<1x2x128xf32>
      tpu.vector_store %arg6[%c0_11, %c0_12, %c0_13], %24 {strides = array<i32>} : memref<10x2x128xf32, #tpu.memory_space<vmem>>, vector<1x2x128xf32>,
      %c1 = arith.constant 1 : index
      %25 = arith.index_cast %8 : i32 to index
      %c0_14 = arith.constant 0 : index
      %26 = vector.load %arg3[%c1, %25, %c0_14] : memref<10x768x128xbf16, #tpu.memory_space<vmem>>, vector<1x64x128xbf16>
      %27 = vector.shape_cast %26 : vector<1x64x128xbf16> to vector<64x128xbf16>
      %28 = arith.extf %27 : vector<64x128xbf16> to vector<64x128xf32>
      %c1_15 = arith.constant 1 : index
      %c0_16 = arith.constant 0 : index
      %c0_17 = arith.constant 0 : index
      %29 = vector.load %arg6[%c1_15, %c0_16, %c0_17] : memref<10x2x128xf32, #tpu.memory_space<vmem>>, vector<1x2x128xf32>
      %30 = vector.shape_cast %29 : vector<1x2x128xf32> to vector<2x128xf32>
      %31 = vector.shape_cast %28 : vector<64x128xf32> to vector<1x64x128xf32>
      %32 = vector.broadcast %31 : vector<1x64x128xf32> to vector<2x64x128xf32>
      %33 = arith.mulf %10, %32 : vector<2x64x128xf32>
      %cst_18 = arith.constant dense<0.000000e+00> : vector<2x128xf32>
      %34 = vector.multi_reduction <add>, %33, %cst_18 [1] : vector<2x64x128xf32> to vector<2x128xf32>
      %35 = arith.addf %30, %34 : vector<2x128xf32>
      %c1_19 = arith.constant 1 : index
      %c0_20 = arith.constant 0 : index
      %c0_21 = arith.constant 0 : index
      %36 = vector.load %arg6[%c1_19, %c0_20, %c0_21] : memref<10x2x128xf32, #tpu.memory_space<vmem>>, vector<1x2x128xf32>
      %37 = vector.shape_cast %36 : vector<1x2x128xf32> to vector<2x128xf32>
      %38 = vector.shape_cast %35 : vector<2x128xf32> to vector<1x2x128xf32>
      tpu.vector_store %arg6[%c1_19, %c0_20, %c0_21], %38 {strides = array<i32>} : memref<10x2x128xf32, #tpu.memory_space<vmem>>, vector<1x2x128xf32>,
      %c2 = arith.constant 2 : index
      %39 = arith.index_cast %8 : i32 to index
      %c0_22 = arith.constant 0 : index
      %40 = vector.load %arg3[%c2, %39, %c0_22] : memref<10x768x128xbf16, #tpu.memory_space<vmem>>, vector<1x64x128xbf16>
      %41 = vector.shape_cast %40 : vector<1x64x128xbf16> to vector<64x128xbf16>
      %42 = arith.extf %41 : vector<64x128xbf16> to vector<64x128xf32>
      %c2_23 = arith.constant 2 : index
      %c0_24 = arith.constant 0 : index
      %c0_25 = arith.constant 0 : index
      %43 = vector.load %arg6[%c2_23, %c0_24, %c0_25] : memref<10x2x128xf32, #tpu.memory_space<vmem>>, vector<1x2x128xf32>
      %44 = vector.shape_cast %43 : vector<1x2x128xf32> to vector<2x128xf32>
      %45 = vector.shape_cast %42 : vector<64x128xf32> to vector<1x64x128xf32>
      %46 = vector.broadcast %45 : vector<1x64x128xf32> to vector<2x64x128xf32>
      %47 = arith.mulf %10, %46 : vector<2x64x128xf32>
      %cst_26 = arith.constant dense<0.000000e+00> : vector<2x128xf32>
      %48 = vector.multi_reduction <add>, %47, %cst_26 [1] : vector<2x64x128xf32> to vector<2x128xf32>
      %49 = arith.addf %44, %48 : vector<2x128xf32>
      %c2_27 = arith.constant 2 : index
      %c0_28 = arith.constant 0 : index
      %c0_29 = arith.constant 0 : index
      %50 = vector.load %arg6[%c2_27, %c0_28, %c0_29] : memref<10x2x128xf32, #tpu.memory_space<vmem>>, vector<1x2x128xf32>
      %51 = vector.shape_cast %50 : vector<1x2x128xf32> to vector<2x128xf32>
      %52 = vector.shape_cast %49 : vector<2x128xf32> to vector<1x2x128xf32>
      tpu.vector_store %arg6[%c2_27, %c0_28, %c0_29], %52 {strides = array<i32>} : memref<10x2x128xf32, #tpu.memory_space<vmem>>, vector<1x2x128xf32>,
      %c3 = arith.constant 3 : index
      %53 = arith.index_cast %8 : i32 to index
      %c0_30 = arith.constant 0 : index
      %54 = vector.load %arg3[%c3, %53, %c0_30] : memref<10x768x128xbf16, #tpu.memory_space<vmem>>, vector<1x64x128xbf16>
      %55 = vector.shape_cast %54 : vector<1x64x128xbf16> to vector<64x128xbf16>
      %56 = arith.extf %55 : vector<64x128xbf16> to vector<64x128xf32>
      %c3_31 = arith.constant 3 : index
      %c0_32 = arith.constant 0 : index
      %c0_33 = arith.constant 0 : index
      %57 = vector.load %arg6[%c3_31, %c0_32, %c0_33] : memref<10x2x128xf32, #tpu.memory_space<vmem>>, vector<1x2x128xf32>
      %58 = vector.shape_cast %57 : vector<1x2x128xf32> to vector<2x128xf32>
      %59 = vector.shape_cast %56 : vector<64x128xf32> to vector<1x64x128xf32>
      %60 = vector.broadcast %59 : vector<1x64x128xf32> to vector<2x64x128xf32>
      %61 = arith.mulf %10, %60 : vector<2x64x128xf32>
      %cst_34 = arith.constant dense<0.000000e+00> : vector<2x128xf32>
      %62 = vector.multi_reduction <add>, %61, %cst_34 [1] : vector<2x64x128xf32> to vector<2x128xf32>
      %63 = arith.addf %58, %62 : vector<2x128xf32>
      %c3_35 = arith.constant 3 : index
      %c0_36 = arith.constant 0 : index
      %c0_37 = arith.constant 0 : index
      %64 = vector.load %arg6[%c3_35, %c0_36, %c0_37] : memref<10x2x128xf32, #tpu.memory_space<vmem>>, vector<1x2x128xf32>
      %65 = vector.shape_cast %64 : vector<1x2x128xf32> to vector<2x128xf32>
      %66 = vector.shape_cast %63 : vector<2x128xf32> to vector<1x2x128xf32>
      tpu.vector_store %arg6[%c3_35, %c0_36, %c0_37], %66 {strides = array<i32>} : memref<10x2x128xf32, #tpu.memory_space<vmem>>, vector<1x2x128xf32>,
      %c4 = arith.constant 4 : index
      %67 = arith.index_cast %8 : i32 to index
      %c0_38 = arith.constant 0 : index
      %68 = vector.load %arg3[%c4, %67, %c0_38] : memref<10x768x128xbf16, #tpu.memory_space<vmem>>, vector<1x64x128xbf16>
      %69 = vector.shape_cast %68 : vector<1x64x128xbf16> to vector<64x128xbf16>
      %70 = arith.extf %69 : vector<64x128xbf16> to vector<64x128xf32>
      %c4_39 = arith.constant 4 : index
      %c0_40 = arith.constant 0 : index
      %c0_41 = arith.constant 0 : index
      %71 = vector.load %arg6[%c4_39, %c0_40, %c0_41] : memref<10x2x128xf32, #tpu.memory_space<vmem>>, vector<1x2x128xf32>
      %72 = vector.shape_cast %71 : vector<1x2x128xf32> to vector<2x128xf32>
      %73 = vector.shape_cast %70 : vector<64x128xf32> to vector<1x64x128xf32>
      %74 = vector.broadcast %73 : vector<1x64x128xf32> to vector<2x64x128xf32>
      %75 = arith.mulf %10, %74 : vector<2x64x128xf32>
      %cst_42 = arith.constant dense<0.000000e+00> : vector<2x128xf32>
      %76 = vector.multi_reduction <add>, %75, %cst_42 [1] : vector<2x64x128xf32> to vector<2x128xf32>
      %77 = arith.addf %72, %76 : vector<2x128xf32>
      %c4_43 = arith.constant 4 : index
      %c0_44 = arith.constant 0 : index
      %c0_45 = arith.constant 0 : index
      %78 = vector.load %arg6[%c4_43, %c0_44, %c0_45] : memref<10x2x128xf32, #tpu.memory_space<vmem>>, vector<1x2x128xf32>
      %79 = vector.shape_cast %78 : vector<1x2x128xf32> to vector<2x128xf32>
      %80 = vector.shape_cast %77 : vector<2x128xf32> to vector<1x2x128xf32>
      tpu.vector_store %arg6[%c4_43, %c0_44, %c0_45], %80 {strides = array<i32>} : memref<10x2x128xf32, #tpu.memory_space<vmem>>, vector<1x2x128xf32>,
      %c5 = arith.constant 5 : index
      %81 = arith.index_cast %8 : i32 to index
      %c0_46 = arith.constant 0 : index
      %82 = vector.load %arg3[%c5, %81, %c0_46] : memref<10x768x128xbf16, #tpu.memory_space<vmem>>, vector<1x64x128xbf16>
      %83 = vector.shape_cast %82 : vector<1x64x128xbf16> to vector<64x128xbf16>
      %84 = arith.extf %83 : vector<64x128xbf16> to vector<64x128xf32>
      %c5_47 = arith.constant 5 : index
      %c0_48 = arith.constant 0 : index
      %c0_49 = arith.constant 0 : index
      %85 = vector.load %arg6[%c5_47, %c0_48, %c0_49] : memref<10x2x128xf32, #tpu.memory_space<vmem>>, vector<1x2x128xf32>
      %86 = vector.shape_cast %85 : vector<1x2x128xf32> to vector<2x128xf32>
      %87 = vector.shape_cast %84 : vector<64x128xf32> to vector<1x64x128xf32>
      %88 = vector.broadcast %87 : vector<1x64x128xf32> to vector<2x64x128xf32>
      %89 = arith.mulf %10, %88 : vector<2x64x128xf32>
      %cst_50 = arith.constant dense<0.000000e+00> : vector<2x128xf32>
      %90 = vector.multi_reduction <add>, %89, %cst_50 [1] : vector<2x64x128xf32> to vector<2x128xf32>
      %91 = arith.addf %86, %90 : vector<2x128xf32>
      %c5_51 = arith.constant 5 : index
      %c0_52 = arith.constant 0 : index
      %c0_53 = arith.constant 0 : index
      %92 = vector.load %arg6[%c5_51, %c0_52, %c0_53] : memref<10x2x128xf32, #tpu.memory_space<vmem>>, vector<1x2x128xf32>
      %93 = vector.shape_cast %92 : vector<1x2x128xf32> to vector<2x128xf32>
      %94 = vector.shape_cast %91 : vector<2x128xf32> to vector<1x2x128xf32>
      tpu.vector_store %arg6[%c5_51, %c0_52, %c0_53], %94 {strides = array<i32>} : memref<10x2x128xf32, #tpu.memory_space<vmem>>, vector<1x2x128xf32>,
      %c6 = arith.constant 6 : index
      %95 = arith.index_cast %8 : i32 to index
      %c0_54 = arith.constant 0 : index
      %96 = vector.load %arg3[%c6, %95, %c0_54] : memref<10x768x128xbf16, #tpu.memory_space<vmem>>, vector<1x64x128xbf16>
      %97 = vector.shape_cast %96 : vector<1x64x128xbf16> to vector<64x128xbf16>
      %98 = arith.extf %97 : vector<64x128xbf16> to vector<64x128xf32>
      %c6_55 = arith.constant 6 : index
      %c0_56 = arith.constant 0 : index
      %c0_57 = arith.constant 0 : index
      %99 = vector.load %arg6[%c6_55, %c0_56, %c0_57] : memref<10x2x128xf32, #tpu.memory_space<vmem>>, vector<1x2x128xf32>
      %100 = vector.shape_cast %99 : vector<1x2x128xf32> to vector<2x128xf32>
      %101 = vector.shape_cast %98 : vector<64x128xf32> to vector<1x64x128xf32>
      %102 = vector.broadcast %101 : vector<1x64x128xf32> to vector<2x64x128xf32>
      %103 = arith.mulf %10, %102 : vector<2x64x128xf32>
      %cst_58 = arith.constant dense<0.000000e+00> : vector<2x128xf32>
      %104 = vector.multi_reduction <add>, %103, %cst_58 [1] : vector<2x64x128xf32> to vector<2x128xf32>
      %105 = arith.addf %100, %104 : vector<2x128xf32>
      %c6_59 = arith.constant 6 : index
      %c0_60 = arith.constant 0 : index
      %c0_61 = arith.constant 0 : index
      %106 = vector.load %arg6[%c6_59, %c0_60, %c0_61] : memref<10x2x128xf32, #tpu.memory_space<vmem>>, vector<1x2x128xf32>
      %107 = vector.shape_cast %106 : vector<1x2x128xf32> to vector<2x128xf32>
      %108 = vector.shape_cast %105 : vector<2x128xf32> to vector<1x2x128xf32>
      tpu.vector_store %arg6[%c6_59, %c0_60, %c0_61], %108 {strides = array<i32>} : memref<10x2x128xf32, #tpu.memory_space<vmem>>, vector<1x2x128xf32>,
      %c7 = arith.constant 7 : index
      %109 = arith.index_cast %8 : i32 to index
      %c0_62 = arith.constant 0 : index
      %110 = vector.load %arg3[%c7, %109, %c0_62] : memref<10x768x128xbf16, #tpu.memory_space<vmem>>, vector<1x64x128xbf16>
      %111 = vector.shape_cast %110 : vector<1x64x128xbf16> to vector<64x128xbf16>
      %112 = arith.extf %111 : vector<64x128xbf16> to vector<64x128xf32>
      %c7_63 = arith.constant 7 : index
      %c0_64 = arith.constant 0 : index
      %c0_65 = arith.constant 0 : index
      %113 = vector.load %arg6[%c7_63, %c0_64, %c0_65] : memref<10x2x128xf32, #tpu.memory_space<vmem>>, vector<1x2x128xf32>
      %114 = vector.shape_cast %113 : vector<1x2x128xf32> to vector<2x128xf32>
      %115 = vector.shape_cast %112 : vector<64x128xf32> to vector<1x64x128xf32>
      %116 = vector.broadcast %115 : vector<1x64x128xf32> to vector<2x64x128xf32>
      %117 = arith.mulf %10, %116 : vector<2x64x128xf32>
      %cst_66 = arith.constant dense<0.000000e+00> : vector<2x128xf32>
      %118 = vector.multi_reduction <add>, %117, %cst_66 [1] : vector<2x64x128xf32> to vector<2x128xf32>
      %119 = arith.addf %114, %118 : vector<2x128xf32>
      %c7_67 = arith.constant 7 : index
      %c0_68 = arith.constant 0 : index
      %c0_69 = arith.constant 0 : index
      %120 = vector.load %arg6[%c7_67, %c0_68, %c0_69] : memref<10x2x128xf32, #tpu.memory_space<vmem>>, vector<1x2x128xf32>
      %121 = vector.shape_cast %120 : vector<1x2x128xf32> to vector<2x128xf32>
      %122 = vector.shape_cast %119 : vector<2x128xf32> to vector<1x2x128xf32>
      tpu.vector_store %arg6[%c7_67, %c0_68, %c0_69], %122 {strides = array<i32>} : memref<10x2x128xf32, #tpu.memory_space<vmem>>, vector<1x2x128xf32>,
      %c8 = arith.constant 8 : index
      %123 = arith.index_cast %8 : i32 to index
      %c0_70 = arith.constant 0 : index
      %124 = vector.load %arg3[%c8, %123, %c0_70] : memref<10x768x128xbf16, #tpu.memory_space<vmem>>, vector<1x64x128xbf16>
      %125 = vector.shape_cast %124 : vector<1x64x128xbf16> to vector<64x128xbf16>
      %126 = arith.extf %125 : vector<64x128xbf16> to vector<64x128xf32>
      %c8_71 = arith.constant 8 : index
      %c0_72 = arith.constant 0 : index
      %c0_73 = arith.constant 0 : index
      %127 = vector.load %arg6[%c8_71, %c0_72, %c0_73] : memref<10x2x128xf32, #tpu.memory_space<vmem>>, vector<1x2x128xf32>
      %128 = vector.shape_cast %127 : vector<1x2x128xf32> to vector<2x128xf32>
      %129 = vector.shape_cast %126 : vector<64x128xf32> to vector<1x64x128xf32>
      %130 = vector.broadcast %129 : vector<1x64x128xf32> to vector<2x64x128xf32>
      %131 = arith.mulf %10, %130 : vector<2x64x128xf32>
      %cst_74 = arith.constant dense<0.000000e+00> : vector<2x128xf32>
      %132 = vector.multi_reduction <add>, %131, %cst_74 [1] : vector<2x64x128xf32> to vector<2x128xf32>
      %133 = arith.addf %128, %132 : vector<2x128xf32>
      %c8_75 = arith.constant 8 : index
      %c0_76 = arith.constant 0 : index
      %c0_77 = arith.constant 0 : index
      %134 = vector.load %arg6[%c8_75, %c0_76, %c0_77] : memref<10x2x128xf32, #tpu.memory_space<vmem>>, vector<1x2x128xf32>
      %135 = vector.shape_cast %134 : vector<1x2x128xf32> to vector<2x128xf32>
      %136 = vector.shape_cast %133 : vector<2x128xf32> to vector<1x2x128xf32>
      tpu.vector_store %arg6[%c8_75, %c0_76, %c0_77], %136 {strides = array<i32>} : memref<10x2x128xf32, #tpu.memory_space<vmem>>, vector<1x2x128xf32>,
      %c9 = arith.constant 9 : index
      %137 = arith.index_cast %8 : i32 to index
      %c0_78 = arith.constant 0 : index
      %138 = vector.load %arg3[%c9, %137, %c0_78] : memref<10x768x128xbf16, #tpu.memory_space<vmem>>, vector<1x64x128xbf16>
      %139 = vector.shape_cast %138 : vector<1x64x128xbf16> to vector<64x128xbf16>
      %140 = arith.extf %139 : vector<64x128xbf16> to vector<64x128xf32>
      %c9_79 = arith.constant 9 : index
      %c0_80 = arith.constant 0 : index
      %c0_81 = arith.constant 0 : index
      %141 = vector.load %arg6[%c9_79, %c0_80, %c0_81] : memref<10x2x128xf32, #tpu.memory_space<vmem>>, vector<1x2x128xf32>
      %142 = vector.shape_cast %141 : vector<1x2x128xf32> to vector<2x128xf32>
      %143 = vector.shape_cast %140 : vector<64x128xf32> to vector<1x64x128xf32>
      %144 = vector.broadcast %143 : vector<1x64x128xf32> to vector<2x64x128xf32>
      %145 = arith.mulf %10, %144 : vector<2x64x128xf32>
      %cst_82 = arith.constant dense<0.000000e+00> : vector<2x128xf32>
      %146 = vector.multi_reduction <add>, %145, %cst_82 [1] : vector<2x64x128xf32> to vector<2x128xf32>
      %147 = arith.addf %142, %146 : vector<2x128xf32>
      %c9_83 = arith.constant 9 : index
      %c0_84 = arith.constant 0 : index
      %c0_85 = arith.constant 0 : index
      %148 = vector.load %arg6[%c9_83, %c0_84, %c0_85] : memref<10x2x128xf32, #tpu.memory_space<vmem>>, vector<1x2x128xf32>
      %149 = vector.shape_cast %148 : vector<1x2x128xf32> to vector<2x128xf32>
      %150 = vector.shape_cast %147 : vector<2x128xf32> to vector<1x2x128xf32>
      tpu.vector_store %arg6[%c9_83, %c0_84, %c0_85], %150 {strides = array<i32>} : memref<10x2x128xf32, #tpu.memory_space<vmem>>, vector<1x2x128xf32>,
    }
    %c12_i32_2 = arith.constant 12 : i32
    %c1_i32_3 = arith.constant 1 : i32
    %4 = arith.cmpi eq, %arg1, %c1_i32_3 : i32
    %5 = arith.extui %4 : i1 to i32
    %c0_i32_4 = arith.constant 0 : i32
    %6 = arith.cmpi ne, %5, %c0_i32_4 : i32
    scf.if %6 {
      %c0 = arith.constant 0 : index
      %c0_5 = arith.constant 0 : index
      %c0_6 = arith.constant 0 : index
      %7 = vector.load %arg6[%c0, %c0_5, %c0_6] : memref<10x2x128xf32, #tpu.memory_space<vmem>>, vector<10x2x128xf32>
      %cst = arith.constant dense<0.000000e+00> : vector<10x2xf32>
      %8 = vector.multi_reduction <add>, %7, %cst [2] : vector<10x2x128xf32> to vector<10x2xf32>
      %c0_i32_7 = arith.constant 0 : i32
      %9 = arith.cmpi eq, %arg0, %c0_i32_7 : i32
      %c0_8 = arith.constant 0 : index
      %c0_9 = arith.constant 0 : index
      %10 = vector.load %arg4[%c0_8, %c0_9] : memref<1x10xf32, #tpu.memory_space<vmem>>, vector<1x10xf32>
      %cst_10 = arith.constant 0.000000e+00 : f32
      %11 = vector.broadcast %cst_10 : f32 to vector<1x10xf32>
      %12 = arith.select %9, %10, %11 : vector<1x10xf32>
      %13 = tpu.transpose %8, [1, 0] : vector<10x2xf32> -> vector<2x10xf32>
      %14 = vector.broadcast %12 : vector<1x10xf32> to vector<2x10xf32>
      %15 = arith.addf %13, %14 : vector<2x10xf32>
      %c0_11 = arith.constant 0 : index
      %c0_12 = arith.constant 0 : index
      %16 = vector.load %arg5[%c0_11, %c0_12] : memref<2x10xf32, #tpu.memory_space<vmem>>, vector<2x10xf32>
      tpu.vector_store %arg5[%c0_11, %c0_12], %15 {strides = array<i32>} : memref<2x10xf32, #tpu.memory_space<vmem>>, vector<2x10xf32>,
    } else {
    }
    return
  }
  func.func @transform_0(%arg0: i32, %arg1: i32) -> (i32, i32, i32) {
    %c2_i32 = arith.constant 2 : i32
    %0 = arith.muli %arg0, %c2_i32 : i32
    %1 = arith.addi %0, %arg1 : i32
    %c0_i32 = arith.constant 0 : i32
    %c0_i32_0 = arith.constant 0 : i32
    %c0_i32_1 = arith.constant 0 : i32
    return %c0_i32, %1, %c0_i32_0 : i32, i32, i32
  }
  func.func @transform_1(%arg0: i32, %arg1: i32) -> (i32, i32, i32) {
    %c2_i32 = arith.constant 2 : i32
    %0 = arith.muli %arg0, %c2_i32 : i32
    %1 = arith.addi %0, %arg1 : i32
    %c0_i32 = arith.constant 0 : i32
    %c0_i32_0 = arith.constant 0 : i32
    %c0_i32_1 = arith.constant 0 : i32
    return %c0_i32, %1, %c0_i32_0 : i32, i32, i32
  }
  func.func @transform_2(%arg0: i32, %arg1: i32) -> (i32, i32) {
    %c0_i32 = arith.constant 0 : i32
    %c0_i32_0 = arith.constant 0 : i32
    %c0_i32_1 = arith.constant 0 : i32
    return %c0_i32, %c0_i32_0 : i32, i32
  }
  func.func @transform_3(%arg0: i32, %arg1: i32) -> (i32, i32) {
    %c0_i32 = arith.constant 0 : i32
    %c0_i32_0 = arith.constant 0 : i32
    %c0_i32_1 = arith.constant 0 : i32
    return %c0_i32, %c0_i32_0 : i32, i32
  }
}

</mosaic_0001>

<bundles_post_ra>
// kernel: linear_pallas.1
= control target key start
LH: loop header
LB: loop body
LE: loop exit
PB: predicated region body
PF: predicated region fallthrough
CT: control target
= control target key end

     0   :  { %8 = vsyncpa [#allocation5], 0  ;;  %s3401_s0 = inlined_call_operand.vmem [shape: f32[2,1536,128], index: 0, kind: input, shape index: {}]   ;;  %s3402_s1 = inlined_call_operand.hbm [shape: bf16[10,1536,128], index: 1, kind: input, shape index: {}]   ;;  %s3403_s2 = inlined_call_operand.vmem [shape: f32[1,10], index: 2, kind: input, shape index: {}]   ;;  %s3404_s3 = inlined_call_operand.hbm [shape: f32[2,10], index: 3, kind: output, shape index: {}]  }
   0x1   :  { %10 = vsyncpa [#allocation5 + $0x1], 0 }
   0x2   :  { %11 = vsyncpa [#allocation6], 0  ;;  %s2581_s12 = smov 0   ;;  %s2583_s13 = smov 0  }
   0x3   :  { %s2585_s14 = smov 0   ;;  %s2587_s15 = smov 0  }
   0x4   :  { %s2589_s16 = smov 0   ;;  %s2591_s17 = smov 0  }
   0x5 LB: > { %s2065_s18 = sadd.s32 4294967295, %s2547_s17   ;;  %s26_s19 = sadd.s32 1, %s2543_s16  ;;  %s2547_s17 = sphi %s2591_s17, %s17_s17   ;;  %s2543_s16 = sphi %s2589_s16, %s3412_s16   ;;  %s2539_s15 = sphi %s2587_s15, %s3411_s15   ;;  %s2535_s14 = sphi %s2585_s14, %s3410_s14   ;;  %s2531_s13 = sphi %s2583_s13, %s3409_s13   ;;  %s2527_s12 = sphi %s2581_s12, %s3408_s12  }
   0x6   : > { %p27_p0 = scmp.ge.s32.totalorder %s26_s19, 2  ;;  %s40_s20 = sadd.s32 1, %s2535_s14 }
   0x7   : > { %p47_p1 = scmp.ne.s32.totalorder %s2535_s14, %s2531_s13  ;;  %p48_p2 = scmp.eq.s32.totalorder %s2547_s17, 0 }
   0x8   : > { %s3414_s19 = smov (%p27_p0, %s26_s19), 0  ;;  %p83_p4 = scmp.ne.s32.totalorder %s2531_s13, %s2527_s12 }
   0x9   : > { %p2617_p3 = por %p48_p2, %p47_p1  ;;  %s37_s22 = ssub.s32 %s2543_s16, %s3414_s19 }
   0xa   : > { %p84_p5 = scmp.eq.s32.totalorder %s2065_s18, 0  ;;  %p38_p6 = scmp.eq.s32.totalorder %s37_s22, 0 }
   0xb   : > { %p2067_p8 = scmp.ge.s32.totalorder %s2547_s17, 2 }
   0xc   : > { %p2626_p7 = por %p84_p5, %p83_p4 }
   0xd   : > { %s2631_s24 = scalar_select %p38_p6, %s2535_s14, %s40_s20  }
   0xe   : > { %148 = sbr.rel (%p2067_p8) target bundleno = 136 (0x88), region = 20 }
  0x15   : > { %151 = sbr.rel (!%p2617_p3) target bundleno = 122 (0x7a), region = 24  ;;  %s153_s25 = sand.u32 (%p2617_p3), 1, %s2535_s14  }
  0x16   : > { %s2163_s26 = smul.u32 (%p2617_p3), 768, %s2543_s16 }
  0x17   : > { %s2364_s27 = smul.u32 (%p2617_p3), 1536, %s153_s25 }
  0x18   : > { %s2641_s30 = scalar_lea.vmem (%p2617_p3), %s3401_s0, %s2163_s26 }
  0x19   : > { %v570_v0 = vld [vmem:[%s2641_s30] sm:$0xff] (%p2617_p3)  ;;  %v572_v1 = vld [vmem:[%s2641_s30 + $0x8] sm:$0xff] (%p2617_p3)  ;;  %v574_v2 = vld [vmem:[%s2641_s30 + $0x10] sm:$0xff] (%p2617_p3)  ;;  %s2646_s4 = scalar_lea.vmem (%p2617_p3), [#allocation3], %s2364_s27 }
  0x1a   : > { %571 = vst [vmem:[%s2646_s4] sm:$0xff] (%p2617_p3), %v570_v0  ;;  %573 = vst [vmem:[%s2646_s4 + $0x8] sm:$0xff] (%p2617_p3), %v572_v1  ;;  %v576_v3 = vld [vmem:[%s2641_s30 + $0x18] sm:$0xff] (%p2617_p3)  ;;  %v578_v4 = vld [vmem:[%s2641_s30 + $0x20] sm:$0xff] (%p2617_p3) }
  0x1b   : > { %575 = vst [vmem:[%s2646_s4 + $0x10] sm:$0xff] (%p2617_p3), %v574_v2  ;;  %v580_v5 = vld [vmem:[%s2641_s30 + $0x28] sm:$0xff] (%p2617_p3)  ;;  %577 = vst [vmem:[%s2646_s4 + $0x18] sm:$0xff] (%p2617_p3), %v576_v3  ;;  %v582_v6 = vld [vmem:[%s2641_s30 + $0x30] sm:$0xff] (%p2617_p3) }
  0x1c   : > { %579 = vst [vmem:[%s2646_s4 + $0x20] sm:$0xff] %v578_v4  ;;  %581 = vst [vmem:[%s2646_s4 + $0x28] sm:$0xff] %v580_v5  ;;  %v584_v7 = vld [vmem:[%s2641_s30 + $0x38] sm:$0xff]  ;;  %v586_v8 = vld [vmem:[%s2641_s30 + $0x40] sm:$0xff] }
  0x1d   : > { %583 = vst [vmem:[%s2646_s4 + $0x30] sm:$0xff] %v582_v6  ;;  %585 = vst [vmem:[%s2646_s4 + $0x38] sm:$0xff] %v584_v7  ;;  %v588_v9 = vld [vmem:[%s2641_s30 + $0x48] sm:$0xff]  ;;  %v590_v10 = vld [vmem:[%s2641_s30 + $0x50] sm:$0xff] }
  0x1e   : > { %587 = vst [vmem:[%s2646_s4 + $0x40] sm:$0xff] %v586_v8  ;;  %v592_v11 = vld [vmem:[%s2641_s30 + $0x58] sm:$0xff]  ;;  %589 = vst [vmem:[%s2646_s4 + $0x48] sm:$0xff] %v588_v9  ;;  %v594_v12 = vld [vmem:[%s2641_s30 + $0x60] sm:$0xff] }
  0x1f   : > { %591 = vst [vmem:[%s2646_s4 + $0x50] sm:$0xff] %v590_v10  ;;  %593 = vst [vmem:[%s2646_s4 + $0x58] sm:$0xff] %v592_v11  ;;  %v596_v13 = vld [vmem:[%s2641_s30 + $0x68] sm:$0xff]  ;;  %v598_v14 = vld [vmem:[%s2641_s30 + $0x70] sm:$0xff] }
  0x20   : > { %595 = vst [vmem:[%s2646_s4 + $0x60] sm:$0xff] %v594_v12  ;;  %597 = vst [vmem:[%s2646_s4 + $0x68] sm:$0xff] %v596_v13  ;;  %v600_v15 = vld [vmem:[%s2641_s30 + $0x78] sm:$0xff]  ;;  %v602_v16 = vld [vmem:[%s2641_s30 + $0x80] sm:$0xff] }
  0x21   : > { %599 = vst [vmem:[%s2646_s4 + $0x70] sm:$0xff] %v598_v14  ;;  %v604_v17 = vld [vmem:[%s2641_s30 + $0x88] sm:$0xff]  ;;  %601 = vst [vmem:[%s2646_s4 + $0x78] sm:$0xff] %v600_v15  ;;  %v606_v18 = vld [vmem:[%s2641_s30 + $0x90] sm:$0xff] }
  0x22   : > { %603 = vst [vmem:[%s2646_s4 + $0x80] sm:$0xff] %v602_v16  ;;  %605 = vst [vmem:[%s2646_s4 + $0x88] sm:$0xff] %v604_v17  ;;  %v608_v19 = vld [vmem:[%s2641_s30 + $0x98] sm:$0xff]  ;;  %v610_v20 = vld [vmem:[%s2641_s30 + $0xa0] sm:$0xff] }
  0x23   : > { %607 = vst [vmem:[%s2646_s4 + $0x90] sm:$0xff] %v606_v18  ;;  %609 = vst [vmem:[%s2646_s4 + $0x98] sm:$0xff] %v608_v19  ;;  %v612_v21 = vld [vmem:[%s2641_s30 + $0xa8] sm:$0xff]  ;;  %v614_v22 = vld [vmem:[%s2641_s30 + $0xb0] sm:$0xff] }
  0x24   : > { %611 = vst [vmem:[%s2646_s4 + $0xa0] sm:$0xff] %v610_v20  ;;  %v616_v23 = vld [vmem:[%s2641_s30 + $0xb8] sm:$0xff]  ;;  %613 = vst [vmem:[%s2646_s4 + $0xa8] sm:$0xff] %v612_v21  ;;  %v618_v24 = vld [vmem:[%s2641_s30 + $0xc0] sm:$0xff] }
  0x25   : > { %615 = vst [vmem:[%s2646_s4 + $0xb0] sm:$0xff] %v614_v22  ;;  %617 = vst [vmem:[%s2646_s4 + $0xb8] sm:$0xff] %v616_v23  ;;  %v620_v25 = vld [vmem:[%s2641_s30 + $0xc8] sm:$0xff]  ;;  %v622_v26 = vld [vmem:[%s2641_s30 + $0xd0] sm:$0xff] }
  0x26   : > { %619 = vst [vmem:[%s2646_s4 + $0xc0] sm:$0xff] %v618_v24  ;;  %621 = vst [vmem:[%s2646_s4 + $0xc8] sm:$0xff] %v620_v25  ;;  %v624_v27 = vld [vmem:[%s2641_s30 + $0xd8] sm:$0xff]  ;;  %v626_v28 = vld [vmem:[%s2641_s30 + $0xe0] sm:$0xff] }
  0x27   : > { %623 = vst [vmem:[%s2646_s4 + $0xd0] sm:$0xff] %v622_v26  ;;  %v628_v29 = vld [vmem:[%s2641_s30 + $0xe8] sm:$0xff]  ;;  %625 = vst [vmem:[%s2646_s4 + $0xd8] sm:$0xff] %v624_v27  ;;  %v630_v30 = vld [vmem:[%s2641_s30 + $0xf0] sm:$0xff] }
  0x28   : > { %627 = vst [vmem:[%s2646_s4 + $0xe0] sm:$0xff] %v626_v28  ;;  %629 = vst [vmem:[%s2646_s4 + $0xe8] sm:$0xff] %v628_v29  ;;  %v632_v31 = vld [vmem:[%s2641_s30 + $0xf8] sm:$0xff]  ;;  %v634_v32 = vld [vmem:[%s2641_s30 + $0x100] sm:$0xff] }
  0x29   : > { %631 = vst [vmem:[%s2646_s4 + $0xf0] sm:$0xff] %v630_v30  ;;  %633 = vst [vmem:[%s2646_s4 + $0xf8] sm:$0xff] %v632_v31  ;;  %v636_v33 = vld [vmem:[%s2641_s30 + $0x108] sm:$0xff]  ;;  %v638_v34 = vld [vmem:[%s2641_s30 + $0x110] sm:$0xff] }
  0x2a   : > { %635 = vst [vmem:[%s2646_s4 + $0x100] sm:$0xff] %v634_v32  ;;  %v640_v35 = vld [vmem:[%s2641_s30 + $0x118] sm:$0xff]  ;;  %637 = vst [vmem:[%s2646_s4 + $0x108] sm:$0xff] %v636_v33  ;;  %v642_v36 = vld [vmem:[%s2641_s30 + $0x120] sm:$0xff] }
  0x2b   : > { %639 = vst [vmem:[%s2646_s4 + $0x110] sm:$0xff] %v638_v34  ;;  %641 = vst [vmem:[%s2646_s4 + $0x118] sm:$0xff] %v640_v35  ;;  %v644_v37 = vld [vmem:[%s2641_s30 + $0x128] sm:$0xff]  ;;  %v646_v38 = vld [vmem:[%s2641_s30 + $0x130] sm:$0xff] }
  0x2c   : > { %643 = vst [vmem:[%s2646_s4 + $0x120] sm:$0xff] %v642_v36  ;;  %645 = vst [vmem:[%s2646_s4 + $0x128] sm:$0xff] %v644_v37  ;;  %v648_v39 = vld [vmem:[%s2641_s30 + $0x138] sm:$0xff]  ;;  %v650_v40 = vld [vmem:[%s2641_s30 + $0x140] sm:$0xff] }
  0x2d   : > { %647 = vst [vmem:[%s2646_s4 + $0x130] sm:$0xff] %v646_v38  ;;  %v652_v41 = vld [vmem:[%s2641_s30 + $0x148] sm:$0xff]  ;;  %649 = vst [vmem:[%s2646_s4 + $0x138] sm:$0xff] %v648_v39  ;;  %v654_v42 = vld [vmem:[%s2641_s30 + $0x150] sm:$0xff] }
  0x2e   : > { %651 = vst [vmem:[%s2646_s4 + $0x140] sm:$0xff] %v650_v40  ;;  %653 = vst [vmem:[%s2646_s4 + $0x148] sm:$0xff] %v652_v41  ;;  %v656_v43 = vld [vmem:[%s2641_s30 + $0x158] sm:$0xff]  ;;  %v658_v44 = vld [vmem:[%s2641_s30 + $0x160] sm:$0xff] }
  0x2f   : > { %655 = vst [vmem:[%s2646_s4 + $0x150] sm:$0xff] %v654_v42  ;;  %657 = vst [vmem:[%s2646_s4 + $0x158] sm:$0xff] %v656_v43  ;;  %v660_v45 = vld [vmem:[%s2641_s30 + $0x168] sm:$0xff]  ;;  %v662_v46 = vld [vmem:[%s2641_s30 + $0x170] sm:$0xff] }
  0x30   : > { %659 = vst [vmem:[%s2646_s4 + $0x160] sm:$0xff] %v658_v44  ;;  %v664_v47 = vld [vmem:[%s2641_s30 + $0x178] sm:$0xff]  ;;  %661 = vst [vmem:[%s2646_s4 + $0x168] sm:$0xff] %v660_v45  ;;  %v666_v48 = vld [vmem:[%s2641_s30 + $0x180] sm:$0xff] }
  0x31   : > { %663 = vst [vmem:[%s2646_s4 + $0x170] sm:$0xff] %v662_v46  ;;  %665 = vst [vmem:[%s2646_s4 + $0x178] sm:$0xff] %v664_v47  ;;  %v668_v49 = vld [vmem:[%s2641_s30 + $0x188] sm:$0xff]  ;;  %v670_v50 = vld [vmem:[%s2641_s30 + $0x190] sm:$0xff] }
  0x32   : > { %667 = vst [vmem:[%s2646_s4 + $0x180] sm:$0xff] %v666_v48  ;;  %669 = vst [vmem:[%s2646_s4 + $0x188] sm:$0xff] %v668_v49  ;;  %v672_v51 = vld [vmem:[%s2641_s30 + $0x198] sm:$0xff]  ;;  %v674_v52 = vld [vmem:[%s2641_s30 + $0x1a0] sm:$0xff] }
  0x33   : > { %671 = vst [vmem:[%s2646_s4 + $0x190] sm:$0xff] %v670_v50  ;;  %v676_v53 = vld [vmem:[%s2641_s30 + $0x1a8] sm:$0xff]  ;;  %673 = vst [vmem:[%s2646_s4 + $0x198] sm:$0xff] %v672_v51  ;;  %v678_v54 = vld [vmem:[%s2641_s30 + $0x1b0] sm:$0xff] }
  0x34   : > { %675 = vst [vmem:[%s2646_s4 + $0x1a0] sm:$0xff] %v674_v52  ;;  %677 = vst [vmem:[%s2646_s4 + $0x1a8] sm:$0xff] %v676_v53  ;;  %v680_v55 = vld [vmem:[%s2641_s30 + $0x1b8] sm:$0xff]  ;;  %v682_v56 = vld [vmem:[%s2641_s30 + $0x1c0] sm:$0xff] }
  0x35   : > { %679 = vst [vmem:[%s2646_s4 + $0x1b0] sm:$0xff] %v678_v54  ;;  %681 = vst [vmem:[%s2646_s4 + $0x1b8] sm:$0xff] %v680_v55  ;;  %v684_v57 = vld [vmem:[%s2641_s30 + $0x1c8] sm:$0xff]  ;;  %v686_v58 = vld [vmem:[%s2641_s30 + $0x1d0] sm:$0xff] }
  0x36   : > { %683 = vst [vmem:[%s2646_s4 + $0x1c0] sm:$0xff] %v682_v56  ;;  %v688_v59 = vld [vmem:[%s2641_s30 + $0x1d8] sm:$0xff]  ;;  %685 = vst [vmem:[%s2646_s4 + $0x1c8] sm:$0xff] %v684_v57  ;;  %v690_v60 = vld [vmem:[%s2641_s30 + $0x1e0] sm:$0xff] }
  0x37   : > { %687 = vst [vmem:[%s2646_s4 + $0x1d0] sm:$0xff] %v686_v58  ;;  %689 = vst [vmem:[%s2646_s4 + $0x1d8] sm:$0xff] %v688_v59  ;;  %v692_v61 = vld [vmem:[%s2641_s30 + $0x1e8] sm:$0xff]  ;;  %v694_v62 = vld [vmem:[%s2641_s30 + $0x1f0] sm:$0xff] }
  0x38   : > { %691 = vst [vmem:[%s2646_s4 + $0x1e0] sm:$0xff] %v690_v60  ;;  %693 = vst [vmem:[%s2646_s4 + $0x1e8] sm:$0xff] %v692_v61  ;;  %v696_v63 = vld [vmem:[%s2641_s30 + $0x1f8] sm:$0xff]  ;;  %v698_v0 = vld [vmem:[%s2641_s30 + $0x200] sm:$0xff] }
  0x39   : > { %695 = vst [vmem:[%s2646_s4 + $0x1f0] sm:$0xff] %v694_v62  ;;  %v700_v1 = vld [vmem:[%s2641_s30 + $0x208] sm:$0xff]  ;;  %697 = vst [vmem:[%s2646_s4 + $0x1f8] sm:$0xff] %v696_v63  ;;  %v702_v2 = vld [vmem:[%s2641_s30 + $0x210] sm:$0xff] }
  0x3a   : > { %699 = vst [vmem:[%s2646_s4 + $0x200] sm:$0xff] %v698_v0  ;;  %701 = vst [vmem:[%s2646_s4 + $0x208] sm:$0xff] %v700_v1  ;;  %v704_v3 = vld [vmem:[%s2641_s30 + $0x218] sm:$0xff]  ;;  %v706_v4 = vld [vmem:[%s2641_s30 + $0x220] sm:$0xff] }
  0x3b   : > { %703 = vst [vmem:[%s2646_s4 + $0x210] sm:$0xff] %v702_v2  ;;  %705 = vst [vmem:[%s2646_s4 + $0x218] sm:$0xff] %v704_v3  ;;  %v708_v5 = vld [vmem:[%s2641_s30 + $0x228] sm:$0xff]  ;;  %v710_v6 = vld [vmem:[%s2641_s30 + $0x230] sm:$0xff] }
  0x3c   : > { %707 = vst [vmem:[%s2646_s4 + $0x220] sm:$0xff] %v706_v4  ;;  %v712_v7 = vld [vmem:[%s2641_s30 + $0x238] sm:$0xff]  ;;  %709 = vst [vmem:[%s2646_s4 + $0x228] sm:$0xff] %v708_v5  ;;  %v714_v8 = vld [vmem:[%s2641_s30 + $0x240] sm:$0xff] }
  0x3d   : > { %711 = vst [vmem:[%s2646_s4 + $0x230] sm:$0xff] %v710_v6  ;;  %713 = vst [vmem:[%s2646_s4 + $0x238] sm:$0xff] %v712_v7  ;;  %v716_v9 = vld [vmem:[%s2641_s30 + $0x248] sm:$0xff]  ;;  %v718_v10 = vld [vmem:[%s2641_s30 + $0x250] sm:$0xff] }
  0x3e   : > { %715 = vst [vmem:[%s2646_s4 + $0x240] sm:$0xff] %v714_v8  ;;  %717 = vst [vmem:[%s2646_s4 + $0x248] sm:$0xff] %v716_v9  ;;  %v720_v11 = vld [vmem:[%s2641_s30 + $0x258] sm:$0xff]  ;;  %v722_v12 = vld [vmem:[%s2641_s30 + $0x260] sm:$0xff] }
  0x3f   : > { %719 = vst [vmem:[%s2646_s4 + $0x250] sm:$0xff] %v718_v10  ;;  %v724_v13 = vld [vmem:[%s2641_s30 + $0x268] sm:$0xff]  ;;  %721 = vst [vmem:[%s2646_s4 + $0x258] sm:$0xff] %v720_v11  ;;  %v726_v14 = vld [vmem:[%s2641_s30 + $0x270] sm:$0xff] }
  0x40   : > { %723 = vst [vmem:[%s2646_s4 + $0x260] sm:$0xff] %v722_v12  ;;  %725 = vst [vmem:[%s2646_s4 + $0x268] sm:$0xff] %v724_v13  ;;  %v728_v15 = vld [vmem:[%s2641_s30 + $0x278] sm:$0xff]  ;;  %v730_v16 = vld [vmem:[%s2641_s30 + $0x280] sm:$0xff] }
  0x41   : > { %727 = vst [vmem:[%s2646_s4 + $0x270] sm:$0xff] %v726_v14  ;;  %729 = vst [vmem:[%s2646_s4 + $0x278] sm:$0xff] %v728_v15  ;;  %v732_v17 = vld [vmem:[%s2641_s30 + $0x288] sm:$0xff]  ;;  %v734_v18 = vld [vmem:[%s2641_s30 + $0x290] sm:$0xff] }
  0x42   : > { %731 = vst [vmem:[%s2646_s4 + $0x280] sm:$0xff] %v730_v16  ;;  %v736_v19 = vld [vmem:[%s2641_s30 + $0x298] sm:$0xff]  ;;  %733 = vst [vmem:[%s2646_s4 + $0x288] sm:$0xff] %v732_v17  ;;  %v738_v20 = vld [vmem:[%s2641_s30 + $0x2a0] sm:$0xff] }
  0x43   : > { %735 = vst [vmem:[%s2646_s4 + $0x290] sm:$0xff] %v734_v18  ;;  %737 = vst [vmem:[%s2646_s4 + $0x298] sm:$0xff] %v736_v19  ;;  %v740_v21 = vld [vmem:[%s2641_s30 + $0x2a8] sm:$0xff]  ;;  %v742_v22 = vld [vmem:[%s2641_s30 + $0x2b0] sm:$0xff] }
  0x44   : > { %739 = vst [vmem:[%s2646_s4 + $0x2a0] sm:$0xff] %v738_v20  ;;  %741 = vst [vmem:[%s2646_s4 + $0x2a8] sm:$0xff] %v740_v21  ;;  %v744_v23 = vld [vmem:[%s2641_s30 + $0x2b8] sm:$0xff]  ;;  %v746_v24 = vld [vmem:[%s2641_s30 + $0x2c0] sm:$0xff] }
  0x45   : > { %743 = vst [vmem:[%s2646_s4 + $0x2b0] sm:$0xff] %v742_v22  ;;  %v748_v25 = vld [vmem:[%s2641_s30 + $0x2c8] sm:$0xff]  ;;  %745 = vst [vmem:[%s2646_s4 + $0x2b8] sm:$0xff] %v744_v23  ;;  %v750_v26 = vld [vmem:[%s2641_s30 + $0x2d0] sm:$0xff] }
  0x46   : > { %747 = vst [vmem:[%s2646_s4 + $0x2c0] sm:$0xff] %v746_v24  ;;  %749 = vst [vmem:[%s2646_s4 + $0x2c8] sm:$0xff] %v748_v25  ;;  %v752_v27 = vld [vmem:[%s2641_s30 + $0x2d8] sm:$0xff]  ;;  %v754_v28 = vld [vmem:[%s2641_s30 + $0x2e0] sm:$0xff] }
  0x47   : > { %751 = vst [vmem:[%s2646_s4 + $0x2d0] sm:$0xff] %v750_v26  ;;  %753 = vst [vmem:[%s2646_s4 + $0x2d8] sm:$0xff] %v752_v27  ;;  %v756_v29 = vld [vmem:[%s2641_s30 + $0x2e8] sm:$0xff]  ;;  %v758_v30 = vld [vmem:[%s2641_s30 + $0x2f0] sm:$0xff] }
  0x48   : > { %755 = vst [vmem:[%s2646_s4 + $0x2e0] sm:$0xff] %v754_v28  ;;  %v760_v31 = vld [vmem:[%s2641_s30 + $0x2f8] sm:$0xff]  ;;  %757 = vst [vmem:[%s2646_s4 + $0x2e8] sm:$0xff] %v756_v29  ;;  %v762_v32 = vld [vmem:[%s2641_s30 + $0x600] sm:$0xff] }
  0x49   : > { %759 = vst [vmem:[%s2646_s4 + $0x2f0] sm:$0xff] %v758_v30  ;;  %761 = vst [vmem:[%s2646_s4 + $0x2f8] sm:$0xff] %v760_v31  ;;  %v764_v33 = vld [vmem:[%s2641_s30 + $0x608] sm:$0xff]  ;;  %v766_v34 = vld [vmem:[%s2641_s30 + $0x610] sm:$0xff] }
  0x4a   : > { %763 = vst [vmem:[%s2646_s4 + $0x300] sm:$0xff] %v762_v32  ;;  %765 = vst [vmem:[%s2646_s4 + $0x308] sm:$0xff] %v764_v33  ;;  %v768_v35 = vld [vmem:[%s2641_s30 + $0x618] sm:$0xff]  ;;  %v770_v36 = vld [vmem:[%s2641_s30 + $0x620] sm:$0xff] }
  0x4b   : > { %767 = vst [vmem:[%s2646_s4 + $0x310] sm:$0xff] %v766_v34  ;;  %v772_v37 = vld [vmem:[%s2641_s30 + $0x628] sm:$0xff]  ;;  %769 = vst [vmem:[%s2646_s4 + $0x318] sm:$0xff] %v768_v35  ;;  %v774_v38 = vld [vmem:[%s2641_s30 + $0x630] sm:$0xff] }
  0x4c   : > { %771 = vst [vmem:[%s2646_s4 + $0x320] sm:$0xff] %v770_v36  ;;  %773 = vst [vmem:[%s2646_s4 + $0x328] sm:$0xff] %v772_v37  ;;  %v776_v39 = vld [vmem:[%s2641_s30 + $0x638] sm:$0xff]  ;;  %v778_v40 = vld [vmem:[%s2641_s30 + $0x640] sm:$0xff] }
  0x4d   : > { %775 = vst [vmem:[%s2646_s4 + $0x330] sm:$0xff] %v774_v38  ;;  %777 = vst [vmem:[%s2646_s4 + $0x338] sm:$0xff] %v776_v39  ;;  %v780_v41 = vld [vmem:[%s2641_s30 + $0x648] sm:$0xff]  ;;  %v782_v42 = vld [vmem:[%s2641_s30 + $0x650] sm:$0xff] }
  0x4e   : > { %779 = vst [vmem:[%s2646_s4 + $0x340] sm:$0xff] %v778_v40  ;;  %v784_v43 = vld [vmem:[%s2641_s30 + $0x658] sm:$0xff]  ;;  %781 = vst [vmem:[%s2646_s4 + $0x348] sm:$0xff] %v780_v41  ;;  %v786_v44 = vld [vmem:[%s2641_s30 + $0x660] sm:$0xff] }
  0x4f   : > { %783 = vst [vmem:[%s2646_s4 + $0x350] sm:$0xff] %v782_v42  ;;  %785 = vst [vmem:[%s2646_s4 + $0x358] sm:$0xff] %v784_v43  ;;  %v788_v45 = vld [vmem:[%s2641_s30 + $0x668] sm:$0xff]  ;;  %v790_v46 = vld [vmem:[%s2641_s30 + $0x670] sm:$0xff] }
  0x50   : > { %787 = vst [vmem:[%s2646_s4 + $0x360] sm:$0xff] %v786_v44  ;;  %789 = vst [vmem:[%s2646_s4 + $0x368] sm:$0xff] %v788_v45  ;;  %v792_v47 = vld [vmem:[%s2641_s30 + $0x678] sm:$0xff]  ;;  %v794_v48 = vld [vmem:[%s2641_s30 + $0x680] sm:$0xff] }
  0x51   : > { %791 = vst [vmem:[%s2646_s4 + $0x370] sm:$0xff] %v790_v46  ;;  %v796_v49 = vld [vmem:[%s2641_s30 + $0x688] sm:$0xff]  ;;  %793 = vst [vmem:[%s2646_s4 + $0x378] sm:$0xff] %v792_v47  ;;  %v798_v50 = vld [vmem:[%s2641_s30 + $0x690] sm:$0xff] }
  0x52   : > { %795 = vst [vmem:[%s2646_s4 + $0x380] sm:$0xff] %v794_v48  ;;  %797 = vst [vmem:[%s2646_s4 + $0x388] sm:$0xff] %v796_v49  ;;  %v800_v51 = vld [vmem:[%s2641_s30 + $0x698] sm:$0xff]  ;;  %v802_v52 = vld [vmem:[%s2641_s30 + $0x6a0] sm:$0xff] }
  0x53   : > { %799 = vst [vmem:[%s2646_s4 + $0x390] sm:$0xff] %v798_v50  ;;  %801 = vst [vmem:[%s2646_s4 + $0x398] sm:$0xff] %v800_v51  ;;  %v804_v53 = vld [vmem:[%s2641_s30 + $0x6a8] sm:$0xff]  ;;  %v806_v54 = vld [vmem:[%s2641_s30 + $0x6b0] sm:$0xff] }
  0x54   : > { %803 = vst [vmem:[%s2646_s4 + $0x3a0] sm:$0xff] %v802_v52  ;;  %v808_v55 = vld [vmem:[%s2641_s30 + $0x6b8] sm:$0xff]  ;;  %805 = vst [vmem:[%s2646_s4 + $0x3a8] sm:$0xff] %v804_v53  ;;  %v810_v56 = vld [vmem:[%s2641_s30 + $0x6c0] sm:$0xff] }
  0x55   : > { %807 = vst [vmem:[%s2646_s4 + $0x3b0] sm:$0xff] %v806_v54  ;;  %809 = vst [vmem:[%s2646_s4 + $0x3b8] sm:$0xff] %v808_v55  ;;  %v812_v57 = vld [vmem:[%s2641_s30 + $0x6c8] sm:$0xff]  ;;  %v814_v58 = vld [vmem:[%s2641_s30 + $0x6d0] sm:$0xff] }
  0x56   : > { %811 = vst [vmem:[%s2646_s4 + $0x3c0] sm:$0xff] %v810_v56  ;;  %813 = vst [vmem:[%s2646_s4 + $0x3c8] sm:$0xff] %v812_v57  ;;  %v816_v59 = vld [vmem:[%s2641_s30 + $0x6d8] sm:$0xff]  ;;  %v818_v60 = vld [vmem:[%s2641_s30 + $0x6e0] sm:$0xff] }
  0x57   : > { %815 = vst [vmem:[%s2646_s4 + $0x3d0] sm:$0xff] %v814_v58  ;;  %v820_v61 = vld [vmem:[%s2641_s30 + $0x6e8] sm:$0xff]  ;;  %817 = vst [vmem:[%s2646_s4 + $0x3d8] sm:$0xff] %v816_v59  ;;  %v822_v62 = vld [vmem:[%s2641_s30 + $0x6f0] sm:$0xff] }
  0x58   : > { %819 = vst [vmem:[%s2646_s4 + $0x3e0] sm:$0xff] %v818_v60  ;;  %821 = vst [vmem:[%s2646_s4 + $0x3e8] sm:$0xff] %v820_v61  ;;  %v824_v63 = vld [vmem:[%s2641_s30 + $0x6f8] sm:$0xff]  ;;  %v826_v0 = vld [vmem:[%s2641_s30 + $0x700] sm:$0xff] }
  0x59   : > { %823 = vst [vmem:[%s2646_s4 + $0x3f0] sm:$0xff] %v822_v62  ;;  %825 = vst [vmem:[%s2646_s4 + $0x3f8] sm:$0xff] %v824_v63  ;;  %v828_v1 = vld [vmem:[%s2641_s30 + $0x708] sm:$0xff]  ;;  %v830_v2 = vld [vmem:[%s2641_s30 + $0x710] sm:$0xff] }
  0x5a   : > { %827 = vst [vmem:[%s2646_s4 + $0x400] sm:$0xff] %v826_v0  ;;  %v832_v3 = vld [vmem:[%s2641_s30 + $0x718] sm:$0xff]  ;;  %829 = vst [vmem:[%s2646_s4 + $0x408] sm:$0xff] %v828_v1  ;;  %v834_v4 = vld [vmem:[%s2641_s30 + $0x720] sm:$0xff] }
  0x5b   : > { %831 = vst [vmem:[%s2646_s4 + $0x410] sm:$0xff] %v830_v2  ;;  %833 = vst [vmem:[%s2646_s4 + $0x418] sm:$0xff] %v832_v3  ;;  %v836_v5 = vld [vmem:[%s2641_s30 + $0x728] sm:$0xff]  ;;  %v838_v6 = vld [vmem:[%s2641_s30 + $0x730] sm:$0xff] }
  0x5c   : > { %835 = vst [vmem:[%s2646_s4 + $0x420] sm:$0xff] %v834_v4  ;;  %837 = vst [vmem:[%s2646_s4 + $0x428] sm:$0xff] %v836_v5  ;;  %v840_v7 = vld [vmem:[%s2641_s30 + $0x738] sm:$0xff]  ;;  %v842_v8 = vld [vmem:[%s2641_s30 + $0x740] sm:$0xff] }
  0x5d   : > { %839 = vst [vmem:[%s2646_s4 + $0x430] sm:$0xff] %v838_v6  ;;  %v844_v9 = vld [vmem:[%s2641_s30 + $0x748] sm:$0xff]  ;;  %841 = vst [vmem:[%s2646_s4 + $0x438] sm:$0xff] %v840_v7  ;;  %v846_v10 = vld [vmem:[%s2641_s30 + $0x750] sm:$0xff] }
  0x5e   : > { %843 = vst [vmem:[%s2646_s4 + $0x440] sm:$0xff] %v842_v8  ;;  %845 = vst [vmem:[%s2646_s4 + $0x448] sm:$0xff] %v844_v9  ;;  %v848_v11 = vld [vmem:[%s2641_s30 + $0x758] sm:$0xff]  ;;  %v850_v12 = vld [vmem:[%s2641_s30 + $0x760] sm:$0xff] }
  0x5f   : > { %847 = vst [vmem:[%s2646_s4 + $0x450] sm:$0xff] %v846_v10  ;;  %849 = vst [vmem:[%s2646_s4 + $0x458] sm:$0xff] %v848_v11  ;;  %v852_v13 = vld [vmem:[%s2641_s30 + $0x768] sm:$0xff]  ;;  %v854_v14 = vld [vmem:[%s2641_s30 + $0x770] sm:$0xff] }
  0x60   : > { %851 = vst [vmem:[%s2646_s4 + $0x460] sm:$0xff] %v850_v12  ;;  %v856_v15 = vld [vmem:[%s2641_s30 + $0x778] sm:$0xff]  ;;  %853 = vst [vmem:[%s2646_s4 + $0x468] sm:$0xff] %v852_v13  ;;  %v858_v16 = vld [vmem:[%s2641_s30 + $0x780] sm:$0xff] }
  0x61   : > { %855 = vst [vmem:[%s2646_s4 + $0x470] sm:$0xff] %v854_v14  ;;  %857 = vst [vmem:[%s2646_s4 + $0x478] sm:$0xff] %v856_v15  ;;  %v860_v17 = vld [vmem:[%s2641_s30 + $0x788] sm:$0xff]  ;;  %v862_v18 = vld [vmem:[%s2641_s30 + $0x790] sm:$0xff] }
  0x62   : > { %859 = vst [vmem:[%s2646_s4 + $0x480] sm:$0xff] %v858_v16  ;;  %861 = vst [vmem:[%s2646_s4 + $0x488] sm:$0xff] %v860_v17  ;;  %v864_v19 = vld [vmem:[%s2641_s30 + $0x798] sm:$0xff]  ;;  %v866_v20 = vld [vmem:[%s2641_s30 + $0x7a0] sm:$0xff] }
  0x63   : > { %863 = vst [vmem:[%s2646_s4 + $0x490] sm:$0xff] %v862_v18  ;;  %v868_v21 = vld [vmem:[%s2641_s30 + $0x7a8] sm:$0xff]  ;;  %865 = vst [vmem:[%s2646_s4 + $0x498] sm:$0xff] %v864_v19  ;;  %v870_v22 = vld [vmem:[%s2641_s30 + $0x7b0] sm:$0xff] }
  0x64   : > { %867 = vst [vmem:[%s2646_s4 + $0x4a0] sm:$0xff] %v866_v20  ;;  %869 = vst [vmem:[%s2646_s4 + $0x4a8] sm:$0xff] %v868_v21  ;;  %v872_v23 = vld [vmem:[%s2641_s30 + $0x7b8] sm:$0xff]  ;;  %v874_v24 = vld [vmem:[%s2641_s30 + $0x7c0] sm:$0xff] }
  0x65   : > { %871 = vst [vmem:[%s2646_s4 + $0x4b0] sm:$0xff] %v870_v22  ;;  %873 = vst [vmem:[%s2646_s4 + $0x4b8] sm:$0xff] %v872_v23  ;;  %v876_v25 = vld [vmem:[%s2641_s30 + $0x7c8] sm:$0xff]  ;;  %v878_v26 = vld [vmem:[%s2641_s30 + $0x7d0] sm:$0xff] }
  0x66   : > { %875 = vst [vmem:[%s2646_s4 + $0x4c0] sm:$0xff] %v874_v24  ;;  %v880_v27 = vld [vmem:[%s2641_s30 + $0x7d8] sm:$0xff]  ;;  %877 = vst [vmem:[%s2646_s4 + $0x4c8] sm:$0xff] %v876_v25  ;;  %v882_v28 = vld [vmem:[%s2641_s30 + $0x7e0] sm:$0xff] }
  0x67   : > { %879 = vst [vmem:[%s2646_s4 + $0x4d0] sm:$0xff] %v878_v26  ;;  %881 = vst [vmem:[%s2646_s4 + $0x4d8] sm:$0xff] %v880_v27  ;;  %v884_v29 = vld [vmem:[%s2641_s30 + $0x7e8] sm:$0xff]  ;;  %v886_v30 = vld [vmem:[%s2641_s30 + $0x7f0] sm:$0xff] }
  0x68   : > { %883 = vst [vmem:[%s2646_s4 + $0x4e0] sm:$0xff] %v882_v28  ;;  %885 = vst [vmem:[%s2646_s4 + $0x4e8] sm:$0xff] %v884_v29  ;;  %v888_v31 = vld [vmem:[%s2641_s30 + $0x7f8] sm:$0xff]  ;;  %v890_v32 = vld [vmem:[%s2641_s30 + $0x800] sm:$0xff] }
  0x69   : > { %887 = vst [vmem:[%s2646_s4 + $0x4f0] sm:$0xff] %v886_v30  ;;  %v892_v33 = vld [vmem:[%s2641_s30 + $0x808] sm:$0xff]  ;;  %889 = vst [vmem:[%s2646_s4 + $0x4f8] sm:$0xff] %v888_v31  ;;  %v894_v34 = vld [vmem:[%s2641_s30 + $0x810] sm:$0xff] }
  0x6a   : > { %891 = vst [vmem:[%s2646_s4 + $0x500] sm:$0xff] %v890_v32  ;;  %893 = vst [vmem:[%s2646_s4 + $0x508] sm:$0xff] %v892_v33  ;;  %v896_v35 = vld [vmem:[%s2641_s30 + $0x818] sm:$0xff]  ;;  %v898_v36 = vld [vmem:[%s2641_s30 + $0x820] sm:$0xff] }
  0x6b   : > { %895 = vst [vmem:[%s2646_s4 + $0x510] sm:$0xff] %v894_v34  ;;  %897 = vst [vmem:[%s2646_s4 + $0x518] sm:$0xff] %v896_v35  ;;  %v900_v37 = vld [vmem:[%s2641_s30 + $0x828] sm:$0xff]  ;;  %v902_v38 = vld [vmem:[%s2641_s30 + $0x830] sm:$0xff] }
  0x6c   : > { %899 = vst [vmem:[%s2646_s4 + $0x520] sm:$0xff] %v898_v36  ;;  %v904_v39 = vld [vmem:[%s2641_s30 + $0x838] sm:$0xff]  ;;  %901 = vst [vmem:[%s2646_s4 + $0x528] sm:$0xff] %v900_v37  ;;  %v906_v40 = vld [vmem:[%s2641_s30 + $0x840] sm:$0xff] }
  0x6d   : > { %903 = vst [vmem:[%s2646_s4 + $0x530] sm:$0xff] %v902_v38  ;;  %905 = vst [vmem:[%s2646_s4 + $0x538] sm:$0xff] %v904_v39  ;;  %v908_v41 = vld [vmem:[%s2641_s30 + $0x848] sm:$0xff]  ;;  %v910_v42 = vld [vmem:[%s2641_s30 + $0x850] sm:$0xff] }
  0x6e   : > { %907 = vst [vmem:[%s2646_s4 + $0x540] sm:$0xff] %v906_v40  ;;  %909 = vst [vmem:[%s2646_s4 + $0x548] sm:$0xff] %v908_v41  ;;  %v912_v43 = vld [vmem:[%s2641_s30 + $0x858] sm:$0xff]  ;;  %v914_v44 = vld [vmem:[%s2641_s30 + $0x860] sm:$0xff] }
  0x6f   : > { %911 = vst [vmem:[%s2646_s4 + $0x550] sm:$0xff] %v910_v42  ;;  %v916_v45 = vld [vmem:[%s2641_s30 + $0x868] sm:$0xff]  ;;  %913 = vst [vmem:[%s2646_s4 + $0x558] sm:$0xff] %v912_v43  ;;  %v918_v46 = vld [vmem:[%s2641_s30 + $0x870] sm:$0xff] }
  0x70   : > { %915 = vst [vmem:[%s2646_s4 + $0x560] sm:$0xff] %v914_v44  ;;  %917 = vst [vmem:[%s2646_s4 + $0x568] sm:$0xff] %v916_v45  ;;  %v920_v47 = vld [vmem:[%s2641_s30 + $0x878] sm:$0xff]  ;;  %v922_v48 = vld [vmem:[%s2641_s30 + $0x880] sm:$0xff] }
  0x71   : > { %919 = vst [vmem:[%s2646_s4 + $0x570] sm:$0xff] %v918_v46  ;;  %921 = vst [vmem:[%s2646_s4 + $0x578] sm:$0xff] %v920_v47  ;;  %v924_v49 = vld [vmem:[%s2641_s30 + $0x888] sm:$0xff]  ;;  %v926_v50 = vld [vmem:[%s2641_s30 + $0x890] sm:$0xff] }
  0x72   : > { %923 = vst [vmem:[%s2646_s4 + $0x580] sm:$0xff] %v922_v48  ;;  %v928_v51 = vld [vmem:[%s2641_s30 + $0x898] sm:$0xff]  ;;  %925 = vst [vmem:[%s2646_s4 + $0x588] sm:$0xff] %v924_v49  ;;  %v930_v52 = vld [vmem:[%s2641_s30 + $0x8a0] sm:$0xff] }
  0x73   : > { %927 = vst [vmem:[%s2646_s4 + $0x590] sm:$0xff] %v926_v50  ;;  %929 = vst [vmem:[%s2646_s4 + $0x598] sm:$0xff] %v928_v51  ;;  %v932_v53 = vld [vmem:[%s2641_s30 + $0x8a8] sm:$0xff]  ;;  %v934_v54 = vld [vmem:[%s2641_s30 + $0x8b0] sm:$0xff] }
  0x74   : > { %931 = vst [vmem:[%s2646_s4 + $0x5a0] sm:$0xff] %v930_v52  ;;  %933 = vst [vmem:[%s2646_s4 + $0x5a8] sm:$0xff] %v932_v53  ;;  %v936_v55 = vld [vmem:[%s2641_s30 + $0x8b8] sm:$0xff]  ;;  %v938_v56 = vld [vmem:[%s2641_s30 + $0x8c0] sm:$0xff] }
  0x75   : > { %935 = vst [vmem:[%s2646_s4 + $0x5b0] sm:$0xff] %v934_v54  ;;  %v940_v57 = vld [vmem:[%s2641_s30 + $0x8c8] sm:$0xff]  ;;  %937 = vst [vmem:[%s2646_s4 + $0x5b8] sm:$0xff] %v936_v55  ;;  %v942_v58 = vld [vmem:[%s2641_s30 + $0x8d0] sm:$0xff] }
  0x76   : > { %939 = vst [vmem:[%s2646_s4 + $0x5c0] sm:$0xff] %v938_v56  ;;  %941 = vst [vmem:[%s2646_s4 + $0x5c8] sm:$0xff] %v940_v57  ;;  %v944_v59 = vld [vmem:[%s2641_s30 + $0x8d8] sm:$0xff]  ;;  %v946_v60 = vld [vmem:[%s2641_s30 + $0x8e0] sm:$0xff] }
  0x77   : > { %943 = vst [vmem:[%s2646_s4 + $0x5d0] sm:$0xff] %v942_v58  ;;  %945 = vst [vmem:[%s2646_s4 + $0x5d8] sm:$0xff] %v944_v59  ;;  %v948_v61 = vld [vmem:[%s2641_s30 + $0x8e8] sm:$0xff]  ;;  %v950_v62 = vld [vmem:[%s2641_s30 + $0x8f0] sm:$0xff] }
  0x78   : > { %947 = vst [vmem:[%s2646_s4 + $0x5e0] sm:$0xff] %v946_v60  ;;  %v952_v63 = vld [vmem:[%s2641_s30 + $0x8f8] sm:$0xff]  ;;  %949 = vst [vmem:[%s2646_s4 + $0x5e8] sm:$0xff] %v948_v61 }
  0x79   : > { %951 = vst [vmem:[%s2646_s4 + $0x5f0] sm:$0xff] %v950_v62  ;;  %953 = vst [vmem:[%s2646_s4 + $0x5f8] sm:$0xff] %v952_v63 }
  0x7a PF: > { %s960_s5 = sand.u32 1, %s2535_s14   ;;  %s2164_s6 = smul.u32 6144, %s2543_s16 }
  0x7b   : > { %s2365_s7 = smul.u32 3840, %s960_s5  ;;  %s2553_s8 = smov 12288  }
  0x7c   : > { %2369 = sst [smem:[#allocation9]] (%p2617_p3), %s2553_s8  ;;  %s972_s12 = scalar_lea.hbm %s3402_s1, %s2164_s6 }
  0x7d   : > { %s2368_s9 = scalar_select %p2617_p3, [#allocation0], [#allocation10] }
  0x7e   : > { %s964_s22 = scalar_lea.vmem [#allocation4], %s2365_s7  ;;  %s2554_s26 = smov 6144  }
  0x7f   : > { %s977_s20 = sld [smem:[%s2368_s9]]   ;;  %s985_s25 = sshll.u32 %s964_s22, 4  ;;  %s986_s25 = int_to_ptr.vmem [resolvable:$true] %s985_s25 }
  0x80   : > { %2370 = sst [smem:[#allocation9 + $0x1]] (%p2617_p3), %s2554_s26  ;;  %s2555_s27 = smov 96  }
  0x81   : > { %2371 = sst [smem:[#allocation9 + $0x2]] (%p2617_p3), %s2555_s27  ;;  %s2556_s28 = smov 64  }
  0x82   : > { %2372 = sst [smem:[#allocation9 + $0x3]] (%p2617_p3), %s2556_s28  ;;  %s2557_s29 = smov 4  }
  0x83   : > { %2373 = sst [smem:[#allocation9 + $0x4]] (%p2617_p3), %s2556_s28  ;;  %s961_s6 = scalar_lea.sflag [#allocation5], %s960_s5 }
  0x84   : > { %2374 = sst [smem:[#allocation9 + $0x5]] (%p2617_p3), %s2557_s29  ;;  %s2558_s7 = smov [#allocation8]  }
  0x85   : > { %s2070_s30 = sshll.u32 %s977_s20, 26 }
  0x86   : > { %s2071_s4 = sadd.s32 134217728, %s2070_s30 }
  0x87   : > { %2375 = dma.general (%p2617_p3), %s972_s12, 61440, %s986_s25, %s961_s6, %s2558_s7, [#allocation9], %s2071_s4, 0  }
  0x88 PF: > { %p2072_p9 = scmp.ge.s32.totalorder %s2547_s17, 1  ;;  %p1006_p10 = scmp.lt.s32.totalorder %s2547_s17, 3 }
  0x8a   : > { %p1007_p11 = pnand %p2072_p9, %p1006_p10 }
  0x8b   : > { %s1013_s8 = sand.u32 (!%p1007_p11), 1, %s2531_s13  }
  0x8c   : > { %1010 = sbr.rel (%p1007_p11) target bundleno = 627 (0x273), region = 66  ;;  %s1020_s20 = scalar_lea.sflag (!%p1007_p11), [#allocation5], %s1013_s8 }
  0x8d   : > { %s2366_s9 = smul.u32 (!%p1007_p11), 1536, %s1013_s8 }
  0x8e   : > { %s2367_s10 = smul.u32 (!%p1007_p11), 3840, %s1013_s8 }
  0x8f   : > { %s3053_s11 = scalar_lea.vmem (!%p1007_p11), [#allocation3], %s2366_s9 }
  0x90   : > { %s3055_s22 = scalar_lea.vmem (!%p1007_p11), [#allocation4], %s2367_s10 }
  0x93   : > { %2518 = dma.done.wait (%p2626_p7), %s1020_s20, 61440  }
  0x94   : > { %2520 = vsyncadd (%p2626_p7), %s1020_s20, 4294905856  ;;  %p2073_p12 = scmp.ne.s32.totalorder %s2539_s15, 0 }
  0x95   : > { %v2559_v0 = vmov (!%p2073_p12), 0.0  }
  0x96   : > { %1054 = sbr.rel (%p2073_p12) target bundleno = 157 (0x9d), region = 78  ;;  %1055 = vst [vmem:[#allocation2] sm:$0x3] (!%p2073_p12), %v2559_v0  ;;  %1056 = vst [vmem:[#allocation2 + $0x2] sm:$0x3] (!%p2073_p12), %v2559_v0 }
  0x97   : > { %1057 = vst [vmem:[#allocation2 + $0x4] sm:$0x3] (!%p2073_p12), %v2559_v0  ;;  %1058 = vst [vmem:[#allocation2 + $0x6] sm:$0x3] (!%p2073_p12), %v2559_v0 }
  0x98   : > { %1059 = vst [vmem:[#allocation2 + $0x8] sm:$0x3] (!%p2073_p12), %v2559_v0  ;;  %1060 = vst [vmem:[#allocation2 + $0xa] sm:$0x3] (!%p2073_p12), %v2559_v0 }
  0x99   : > { %1061 = vst [vmem:[#allocation2 + $0xc] sm:$0x3] (!%p2073_p12), %v2559_v0  ;;  %1062 = vst [vmem:[#allocation2 + $0xe] sm:$0x3] (!%p2073_p12), %v2559_v0 }
  0x9a   : > { %1063 = vst [vmem:[#allocation2 + $0x10] sm:$0x3] (!%p2073_p12), %v2559_v0  ;;  %1064 = vst [vmem:[#allocation2 + $0x12] sm:$0x3] (!%p2073_p12), %v2559_v0 }
  0x9d PF: > { %s3062_s21 = smov 0  }
  0x9e LB: >> { %s2074_s23 = sshll.u32 %s2551_s21, 6  ;;  %vm1154_vm0 = vcmask 1041409   ;;  %s1070_s21 = sadd.s32 1, %s2551_s21   ;;  %s2551_s21 = sphi %s3062_s21, %s1070_s21  }
  0x9f   : >> { %s1089_s5 = sshra.s32 %s2074_s23, 3  ;;  %s3069_s25 = scalar_lea.vmem %s3053_s11, %s2074_s23 [#allocation3] }
  0xa0   : >> { %s2075_s12 = sshll.u32 %s1089_s5, 2  ;;  %v3075_v1 = vld [vmem:[%s3069_s25] sm:$0xff]  ;;  %v3078_v2 = vld [vmem:[%s3069_s25 + $0x8] sm:$0xff]  ;;  %v3083_v5 = vld [vmem:[%s3069_s25 + $0x10] sm:$0xff]  ;;  %p1067_p13 = scmp.ge.s32.totalorder %s1070_s21, 12  }
  0xa1   : >> { %s3072_s26 = scalar_lea.vmem %s3055_s22, %s2075_s12 [#allocation4]  ;;  %v3088_v11 = vld [vmem:[%s3069_s25 + $0x300] sm:$0xff]  ;;  %v3091_v12 = vld [vmem:[%s3069_s25 + $0x308] sm:$0xff]  ;;  %v3094_v13 = vld [vmem:[%s3069_s25 + $0x310] sm:$0xff]  ;;  %p2157_p0 = scmp.ne.s32.totalorder (%p1067_p13), %s2539_s15, 1 }
  0xa2   : >> { %v2166_v3 = vld [vmem:[%s3072_s26] sm:$0xff]   ;;  %v2325_v4 = vld [vmem:[%s3072_s26 + $0x8] sm:$0xff]   ;;  %v2326_v9 = vld [vmem:[%s3072_s26 + $0x10] sm:$0xff]  }
  0xa3   : >> { %v2167_v6 = vunpack.c.l.bf16 %v2166_v3  ;;  %v2168_v7 = vunpack.c.h.bf16 %v2166_v3  ;;  %v2171_v8 = vunpack.c.l.bf16 %v2325_v4  ;;  %v2327_v10 = vld [vmem:[%s3072_s26 + $0x18] sm:$0xff]   ;;  %v2172_v14 = vunpack.c.h.bf16 %v2325_v4  ;;  %v3105_v19 = vld [vmem:[%s3069_s25 + $0x20] sm:$0xff]  ;;  %v3109_v25 = vld [vmem:[%s3069_s25 + $0x28] sm:$0xff] }
  0xa4   : >> { %v3097_v15 = vld [vmem:[%s3069_s25 + $0x18] sm:$0xff]  ;;  %v2175_v20 = vunpack.c.l.bf16 %v2326_v9  ;;  %v2176_v21 = vunpack.c.h.bf16 %v2326_v9  ;;  %v2179_v22 = vunpack.c.l.bf16 %v2327_v10  ;;  %v2180_v23 = vunpack.c.h.bf16 %v2327_v10  ;;  %v2328_v24 = vld [vmem:[%s3072_s26 + $0x180] sm:$0xff]   ;;  %v3112_v26 = vld [vmem:[%s3069_s25 + $0x30] sm:$0xff] }
  0xa5   : >> { %v3100_v16 = vld [vmem:[%s3069_s25 + $0x318] sm:$0xff]  ;;  %v1110_v17 = vmul.f32 %v2167_v6, %v3075_v1  ;;  %v1111_v18 = vmul.f32 %v2168_v7, %v3078_v2  ;;  %v1112_v28 = vmul.f32 %v2171_v8, %v3083_v5  ;;  %v1118_v29 = vmul.f32 %v2167_v6, %v3088_v11  ;;  %v3122_v32 = vld [vmem:[%s3069_s25 + $0x320] sm:$0xff]  ;;  %v2329_v35 = vld [vmem:[%s3072_s26 + $0x188] sm:$0xff]  }
  0xa6   : >> { %v3115_v27 = vld [vmem:[%s3069_s25 + $0x38] sm:$0xff]  ;;  %v1119_v30 = vmul.f32 %v2168_v7, %v3091_v12  ;;  %v1120_v31 = vmul.f32 %v2171_v8, %v3094_v13  ;;  %v1113_v33 = vmul.f32 %v2172_v14, %v3097_v15  ;;  %v1121_v34 = vmul.f32 %v2172_v14, %v3100_v16  ;;  %v3128_v36 = vld [vmem:[%s3069_s25 + $0x328] sm:$0xff]  ;;  %v3131_v37 = vld [vmem:[%s3069_s25 + $0x330] sm:$0xff] }
  0xa7   : >> { %v1126_v38 = vadd.f32 %v1111_v18, %v1110_v17  ;;  %v2183_v40 = vunpack.c.l.bf16 %v2328_v24  ;;  %v2184_v41 = vunpack.c.h.bf16 %v2328_v24  ;;  %v2330_v42 = vld [vmem:[%s3072_s26 + $0x190] sm:$0xff]   ;;  %v1114_v43 = vmul.f32 %v2175_v20, %v3105_v19  ;;  %v2331_v51 = vld [vmem:[%s3072_s26 + $0x198] sm:$0xff]  }
  0xa8   : >> { %v1139_v39 = vadd.f32 %v1119_v30, %v1118_v29  ;;  %v1115_v44 = vmul.f32 %v2176_v21, %v3109_v25  ;;  %v1116_v45 = vmul.f32 %v2179_v22, %v3112_v26  ;;  %v1117_v46 = vmul.f32 %v2180_v23, %v3115_v27  ;;  %v3143_v56 = vld [vmem:[%s3069_s25 + $0x338] sm:$0xff] }
  0xa9   : >> { %v1122_v47 = vmul.f32 %v2175_v20, %v3122_v32  ;;  %v1127_v48 = vadd.f32 %v1126_v38, %v1112_v28  ;;  %v2187_v50 = vunpack.c.l.bf16 %v2329_v35  ;;  %v1123_v52 = vmul.f32 %v2176_v21, %v3128_v36 }
  0xaa   : >> { %v1140_v49 = vadd.f32 %v1139_v39, %v1120_v31  ;;  %v1124_v53 = vmul.f32 %v2179_v22, %v3131_v37  ;;  %v2188_v54 = vunpack.c.h.bf16 %v2329_v35  ;;  %v2191_v55 = vunpack.c.l.bf16 %v2330_v42  ;;  %v2333_v35 = vld [vmem:[%s3072_s26 + $0x308] sm:$0xff]  }
  0xab   : >> { %v1128_v57 = vadd.f32 %v1127_v48, %v1113_v33  ;;  %v1180_v59 = vmul.f32 %v2183_v40, %v3075_v1  ;;  %v1181_v60 = vmul.f32 %v2184_v41, %v3078_v2  ;;  %v2192_v61 = vunpack.c.h.bf16 %v2330_v42  ;;  %v2334_v48 = vld [vmem:[%s3072_s26 + $0x310] sm:$0xff]  }
  0xac   : >> { %v1141_v58 = vadd.f32 %v1140_v49, %v1121_v34  ;;  %v2195_v62 = vunpack.c.l.bf16 %v2331_v51  ;;  %v1188_v63 = vmul.f32 %v2183_v40, %v3088_v11  ;;  %v1189_v0 = vmul.f32 %v2184_v41, %v3091_v12  ;;  %v2332_v34 = vld [vmem:[%s3072_s26 + $0x300] sm:$0xff]   ;;  %v3166_v49 = vld [vmem:[%s3072_s26 + $0x318] sm:$0xff]  }
  0xad   : >> { %v1129_v3 = vadd.f32 %v1128_v57, %v1114_v43  ;;  %v1182_v6 = vmul.f32 %v2187_v50, %v3083_v5  ;;  %v1190_v7 = vmul.f32 %v2187_v50, %v3094_v13  ;;  %v1125_v8 = vmul.f32 %v2180_v23, %v3143_v56 }
  0xae   : >> { %v1142_v4 = vadd.f32 %v1141_v58, %v1122_v47  ;;  %v2196_v9 = vunpack.c.h.bf16 %v2331_v51  ;;  %v1183_v10 = vmul.f32 %v2188_v54, %v3097_v15  ;;  %v1191_v14 = vmul.f32 %v2188_v54, %v3100_v16 }
  0xaf   : >> { %v1130_v17 = vadd.f32 %v1129_v3, %v1115_v44  ;;  %v1196_v20 = vadd.f32 %v1181_v60, %v1180_v59  ;;  %v1209_v21 = vadd.f32 %v1189_v0, %v1188_v63  ;;  %v1184_v22 = vmul.f32 %v2191_v55, %v3105_v19 }
  0xb0   : >> { %v1143_v18 = vadd.f32 %v1142_v4, %v1123_v52  ;;  %v1185_v24 = vmul.f32 %v2192_v61, %v3109_v25  ;;  %v1186_v28 = vmul.f32 %v2195_v62, %v3112_v26  ;;  %v1192_v23 = vmul.f32 %v2191_v55, %v3122_v32 }
  0xb1   : >> { %v1131_v29 = vadd.f32 %v1130_v17, %v1116_v45  ;;  %v1197_v31 = vadd.f32 %v1196_v20, %v1182_v6  ;;  %v1210_v33 = vadd.f32 %v1209_v21, %v1190_v7  ;;  %v1187_v38 = vmul.f32 %v2196_v9, %v3115_v27 }
  0xb2   : >> { %v1144_v30 = vadd.f32 %v1143_v18, %v1124_v53  ;;  %v1193_v39 = vmul.f32 %v2192_v61, %v3128_v36  ;;  %v1194_v40 = vmul.f32 %v2195_v62, %v3131_v37  ;;  %v1195_v41 = vmul.f32 %v2196_v9, %v3143_v56 }
  0xb3   : >> { %v1132_v42 = vadd.f32 %v1131_v29, %v1117_v46  ;;  %v1198_v44 = vadd.f32 %v1197_v31, %v1183_v10  ;;  %v1211_v47 = vadd.f32 %v1210_v33, %v1191_v14  ;;  %v2199_v45 = vunpack.c.l.bf16 %v2332_v34 }
  0xb4   : >> { %v1145_v43 = vadd.f32 %v1144_v30, %v1125_v8  ;;  %v2200_v50 = vunpack.c.h.bf16 %v2332_v34  ;;  %v2203_v51 = vunpack.c.l.bf16 %v2333_v35  ;;  %v2204_v52 = vunpack.c.h.bf16 %v2333_v35 }
  0xb5   : >> { %v1133_v53 = vrot.slane %v1132_v42, 4  ;;  %v1199_v55 = vadd.f32 %v1198_v44, %v1184_v22  ;;  %v1212_v57 = vadd.f32 %v1211_v47, %v1192_v23  ;;  %v2207_v58 = vunpack.c.l.bf16 %v2334_v48 }
  0xb6   : >> { %v1146_v54 = vrot.slane %v1145_v43, 4  ;;  %v2208_v59 = vunpack.c.h.bf16 %v2334_v48  ;;  %v2211_v60 = vunpack.c.l.bf16 %v3166_v49  ;;  %v2212_v46 = vunpack.c.h.bf16 %v3166_v49  ;;  %v2336_v48 = vld [vmem:[%s3072_s26 + $0x480] sm:$0xff]  }
  0xb7   : >> { %v1134_v61 = vadd.f32 %v1133_v53, %v1132_v42  ;;  %v1200_v63 = vadd.f32 %v1199_v55, %v1185_v24  ;;  %v1213_v0 = vadd.f32 %v1212_v57, %v1193_v39  ;;  %v1249_v3 = vmul.f32 %v2199_v45, %v3075_v1 }
  0xb8   : >> { %v1147_v62 = vadd.f32 %v1146_v54, %v1145_v43  ;;  %v1250_v4 = vmul.f32 %v2200_v50, %v3078_v2  ;;  %v1257_v6 = vmul.f32 %v2199_v45, %v3088_v11  ;;  %v1258_v7 = vmul.f32 %v2200_v50, %v3091_v12 }
  0xb9   : >> { %v1135_v8 = vrot.slane %v1134_v61, 2  ;;  %v1201_v10 = vadd.f32 %v1200_v63, %v1186_v28  ;;  %v1214_v14 = vadd.f32 %v1213_v0, %v1194_v40  ;;  %v1251_v17 = vmul.f32 %v2203_v51, %v3083_v5 }
  0xba   : >> { %v1148_v9 = vrot.slane %v1147_v62, 2  ;;  %v1252_v18 = vmul.f32 %v2204_v52, %v3097_v15  ;;  %v1253_v20 = vmul.f32 %v2207_v58, %v3105_v19  ;;  %v1259_v21 = vmul.f32 %v2203_v51, %v3094_v13 }
  0xbb   : >> { %v1136_v22 = vadd.f32 %v1135_v8, %v1134_v61  ;;  %v1202_v23 = vadd.f32 %v1201_v10, %v1187_v38  ;;  %v1215_v29 = vadd.f32 %v1214_v14, %v1195_v41  ;;  %v1254_v30 = vmul.f32 %v2208_v59, %v3109_v25  ;;  %v1109_v38 = vld [vmem:[#allocation2] sm:$0x3] }
  0xbc   : >> { %v1149_v24 = vadd.f32 %v1148_v9, %v1147_v62  ;;  %v1260_v31 = vmul.f32 %v2204_v52, %v3100_v16  ;;  %v1265_v33 = vadd.f32 %v1250_v4, %v1249_v3  ;;  %v1278_v28 = vadd.f32 %v1258_v7, %v1257_v6  ;;  %v2337_v62 = vld [vmem:[%s3072_s26 + $0x488] sm:$0xff]   ;;  %v2338_v6 = vld [vmem:[%s3072_s26 + $0x490] sm:$0xff]  }
  0xbd   : >> { %v1137_v34 = vrot.slane %v1136_v22, 1  ;;  %v1203_v39 = vrot.slane %v1202_v23, 4  ;;  %v1216_v40 = vrot.slane %v1215_v29, 4  ;;  %v1255_v42 = vmul.f32 %v2211_v60, %v3112_v26 }
  0xbe   : >> { %v1150_v35 = vrot.slane %v1149_v24, 1  ;;  %v1261_v43 = vmul.f32 %v2207_v58, %v3122_v32  ;;  %v1266_v44 = vadd.f32 %v1265_v33, %v1251_v17  ;;  %v1279_v47 = vadd.f32 %v1278_v28, %v1259_v21  ;;  %v1179_v28 = vld [vmem:[#allocation2 + $0x2] sm:$0x3] }
  0xbf   : >> { %v1138_v41 = vadd.f32 %v1137_v34, %v1136_v22  ;;  %v1204_v45 = vadd.f32 %v1203_v39, %v1202_v23  ;;  %v1217_v50 = vadd.f32 %v1216_v40, %v1215_v29  ;;  %v1262_v51 = vmul.f32 %v2208_v59, %v3128_v36 }
  0xc0   : >> { %v1151_v49 = vadd.f32 %v1150_v35, %v1149_v24  ;;  %v1263_v52 = vmul.f32 %v2211_v60, %v3131_v37  ;;  %v1267_v53 = vadd.f32 %v1266_v44, %v1252_v18  ;;  %v1280_v54 = vadd.f32 %v1279_v47, %v1260_v31 }
  0xc1   : >> { %v1205_v57 = vrot.slane %v1204_v45, 2  ;;  %v1218_v58 = vrot.slane %v1217_v50, 2  ;;  %v2215_v61 = vunpack.c.l.bf16 %v2336_v48  ;;  %v2216_v4 = vunpack.c.h.bf16 %v2336_v48 }
  0xc2   : >> { %v1155_v55 = vsel %vm1154_vm0, %v1151_v49, %v1138_v41  ;;  %v1268_v0 = vadd.f32 %v1267_v53, %v1253_v20  ;;  %v1281_v3 = vadd.f32 %v1280_v54, %v1261_v43  ;;  %v1256_v59 = vmul.f32 %v2212_v46, %v3115_v27  ;;  %v2339_v20 = vld [vmem:[%s3072_s26 + $0x498] sm:$0xff]  }
  0xc3   : >> { %v1157_v63 = vadd.f32 %v1155_v55, %v1109_v38  ;;  %v1206_v7 = vadd.f32 %v1205_v57, %v1204_v45  ;;  %v1219_v8 = vadd.f32 %v1218_v58, %v1217_v50  ;;  %v1264_v60 = vmul.f32 %v2212_v46, %v3143_v56  ;;  %v2340_v55 = vld [vmem:[%s3072_s26 + $0x600] sm:$0xff]  }
  0xc4   : >> { %v1269_v9 = vadd.f32 %v1268_v0, %v1254_v30  ;;  %v1282_v10 = vadd.f32 %v1281_v3, %v1262_v51  ;;  %v2219_v14 = vunpack.c.l.bf16 %v2337_v62  ;;  %v2220_v17 = vunpack.c.h.bf16 %v2337_v62 }
  0xc5   : >> { %1158 = vst [vmem:[#allocation2] sm:$0x3] %v1157_v63  ;;  %v1207_v18 = vrot.slane %v1206_v7, 1  ;;  %v1220_v21 = vrot.slane %v1219_v8, 1  ;;  %v2223_v22 = vunpack.c.l.bf16 %v2338_v6  ;;  %v2224_v24 = vunpack.c.h.bf16 %v2338_v6  ;;  %v2341_v6 = vld [vmem:[%s3072_s26 + $0x608] sm:$0xff]  }
  0xc6   : >> { %v1270_v23 = vadd.f32 %v1269_v9, %v1255_v42  ;;  %v1283_v29 = vadd.f32 %v1282_v10, %v1263_v52  ;;  %v1318_v31 = vmul.f32 %v2215_v61, %v3075_v1  ;;  %v1319_v33 = vmul.f32 %v2216_v4, %v3078_v2  ;;  %v2342_v9 = vld [vmem:[%s3072_s26 + $0x610] sm:$0xff]  }
  0xc7   : >> { %v1208_v34 = vadd.f32 %v1207_v18, %v1206_v7  ;;  %v1221_v35 = vadd.f32 %v1220_v21, %v1219_v8  ;;  %v1326_v46 = vmul.f32 %v2215_v61, %v3088_v11  ;;  %v1327_v30 = vmul.f32 %v2216_v4, %v3091_v12 }
  0xc8   : >> { %v1271_v39 = vadd.f32 %v1270_v23, %v1256_v59  ;;  %v1284_v40 = vadd.f32 %v1283_v29, %v1264_v60  ;;  %v2227_v43 = vunpack.c.l.bf16 %v2339_v20  ;;  %v2228_v44 = vunpack.c.h.bf16 %v2339_v20 }
  0xc9   : >> { %v1224_v47 = vsel %vm1154_vm0, %v1221_v35, %v1208_v34  ;;  %v1320_v42 = vmul.f32 %v2219_v14, %v3083_v5  ;;  %v1321_v48 = vmul.f32 %v2220_v17, %v3097_v15  ;;  %v1328_v38 = vmul.f32 %v2219_v14, %v3094_v13 }
  0xca   : >> { %v1226_v41 = vadd.f32 %v1224_v47, %v1179_v28  ;;  %v1272_v49 = vrot.slane %v1271_v39, 4  ;;  %v1285_v45 = vrot.slane %v1284_v40, 4  ;;  %v1322_v50 = vmul.f32 %v2223_v22, %v3105_v19  ;;  %v2343_v28 = vld [vmem:[%s3072_s26 + $0x618] sm:$0xff]   ;;  %v1248_v47 = vld [vmem:[#allocation2 + $0x4] sm:$0x3] }
  0xcb   : >> { %v1323_v51 = vmul.f32 %v2224_v24, %v3109_v25  ;;  %v1329_v52 = vmul.f32 %v2220_v17, %v3100_v16  ;;  %v1334_v53 = vadd.f32 %v1319_v33, %v1318_v31  ;;  %v1347_v54 = vadd.f32 %v1327_v30, %v1326_v46 }
  0xcc   : >> { %1227 = vst [vmem:[#allocation2 + $0x2] sm:$0x3] %v1226_v41  ;;  %v1273_v57 = vadd.f32 %v1272_v49, %v1271_v39  ;;  %v1286_v58 = vadd.f32 %v1285_v45, %v1284_v40  ;;  %v1324_v61 = vmul.f32 %v2227_v43, %v3112_v26  ;;  %v1325_v62 = vmul.f32 %v2228_v44, %v3115_v27 }
  0xcd   : >> { %v1330_v63 = vmul.f32 %v2223_v22, %v3122_v32  ;;  %v1331_v0 = vmul.f32 %v2224_v24, %v3128_v36  ;;  %v1335_v3 = vadd.f32 %v1334_v53, %v1320_v42  ;;  %v1348_v4 = vadd.f32 %v1347_v54, %v1328_v38 }
  0xce   : >> { %v1274_v7 = vrot.slane %v1273_v57, 2  ;;  %v1287_v8 = vrot.slane %v1286_v58, 2  ;;  %v2231_v59 = vunpack.c.l.bf16 %v2340_v55  ;;  %v2232_v60 = vunpack.c.h.bf16 %v2340_v55 }
  0xcf   : >> { %v1332_v10 = vmul.f32 %v2227_v43, %v3131_v37  ;;  %v1333_v14 = vmul.f32 %v2228_v44, %v3143_v56  ;;  %v1336_v17 = vadd.f32 %v1335_v3, %v1321_v48  ;;  %v1349_v18 = vadd.f32 %v1348_v4, %v1329_v52 }
  0xd0   : >> { %v1275_v21 = vadd.f32 %v1274_v7, %v1273_v57  ;;  %v1288_v20 = vadd.f32 %v1287_v8, %v1286_v58  ;;  %v2235_v22 = vunpack.c.l.bf16 %v2341_v6  ;;  %v2236_v23 = vunpack.c.h.bf16 %v2341_v6  ;;  %v2344_v6 = vld [vmem:[%s3072_s26 + $0x780] sm:$0xff]  }
  0xd1   : >> { %v1337_v24 = vadd.f32 %v1336_v17, %v1322_v50  ;;  %v1350_v29 = vadd.f32 %v1349_v18, %v1330_v63  ;;  %v2239_v31 = vunpack.c.l.bf16 %v2342_v9  ;;  %v2240_v33 = vunpack.c.h.bf16 %v2342_v9  ;;  %v2345_v17 = vld [vmem:[%s3072_s26 + $0x788] sm:$0xff]  }
  0xd2   : >> { %v1276_v34 = vrot.slane %v1275_v21, 1  ;;  %v1289_v35 = vrot.slane %v1288_v20, 1  ;;  %v1387_v46 = vmul.f32 %v2231_v59, %v3075_v1  ;;  %v1388_v30 = vmul.f32 %v2232_v60, %v3078_v2 }
  0xd3   : >> { %v1338_v39 = vadd.f32 %v1337_v24, %v1323_v51  ;;  %v1351_v40 = vadd.f32 %v1350_v29, %v1331_v0  ;;  %v1395_v43 = vmul.f32 %v2231_v59, %v3088_v11  ;;  %v1396_v44 = vmul.f32 %v2232_v60, %v3091_v12 }
  0xd4   : >> { %v1277_v42 = vadd.f32 %v1276_v34, %v1275_v21  ;;  %v1290_v48 = vadd.f32 %v1289_v35, %v1288_v20  ;;  %v2243_v38 = vunpack.c.l.bf16 %v2343_v28  ;;  %v1389_v41 = vmul.f32 %v2235_v22, %v3083_v5 }
  0xd5   : >> { %v1339_v49 = vadd.f32 %v1338_v39, %v1324_v61  ;;  %v1352_v45 = vadd.f32 %v1351_v40, %v1332_v10  ;;  %v2244_v50 = vunpack.c.h.bf16 %v2343_v28  ;;  %v1397_v52 = vmul.f32 %v2235_v22, %v3094_v13 }
  0xd6   : >> { %v1293_v53 = vsel %vm1154_vm0, %v1290_v48, %v1277_v42  ;;  %v1390_v51 = vmul.f32 %v2236_v23, %v3097_v15  ;;  %v1398_v54 = vmul.f32 %v2236_v23, %v3100_v16  ;;  %v1403_v55 = vadd.f32 %v1388_v30, %v1387_v46  ;;  %v2346_v23 = vld [vmem:[%s3072_s26 + $0x790] sm:$0xff]  }
  0xd7   : >> { %v1295_v57 = vadd.f32 %v1293_v53, %v1248_v47  ;;  %v1340_v58 = vadd.f32 %v1339_v49, %v1325_v62  ;;  %v1353_v63 = vadd.f32 %v1352_v45, %v1333_v14  ;;  %v1416_v0 = vadd.f32 %v1396_v44, %v1395_v43  ;;  %v2347_v44 = vld [vmem:[%s3072_s26 + $0x798] sm:$0xff]  }
  0xd8   : >> { %v1391_v3 = vmul.f32 %v2239_v31, %v3105_v19  ;;  %v1392_v61 = vmul.f32 %v2240_v33, %v3109_v25  ;;  %v1404_v4 = vadd.f32 %v1403_v55, %v1389_v41  ;;  %v1399_v59 = vmul.f32 %v2239_v31, %v3122_v32 }
  0xd9   : >> { %1296 = vst [vmem:[#allocation2 + $0x4] sm:$0x3] %v1295_v57  ;;  %v1341_v7 = vrot.slane %v1340_v58, 4  ;;  %v1354_v8 = vrot.slane %v1353_v63, 4  ;;  %v1417_v60 = vadd.f32 %v1416_v0, %v1397_v52  ;;  %v1393_v9 = vmul.f32 %v2243_v38, %v3112_v26  ;;  %v1317_v0 = vld [vmem:[#allocation2 + $0x6] sm:$0x3] }
  0xda   : >> { %v1394_v62 = vmul.f32 %v2244_v50, %v3115_v27  ;;  %v1400_v10 = vmul.f32 %v2240_v33, %v3128_v36  ;;  %v1405_v14 = vadd.f32 %v1404_v4, %v1390_v51  ;;  %v2247_v22 = vunpack.c.l.bf16 %v2344_v6 }
  0xdb   : >> { %v1342_v18 = vadd.f32 %v1341_v7, %v1340_v58  ;;  %v1355_v21 = vadd.f32 %v1354_v8, %v1353_v63  ;;  %v1418_v20 = vadd.f32 %v1417_v60, %v1398_v54  ;;  %v1401_v24 = vmul.f32 %v2243_v38, %v3131_v37 }
  0xdc   : >> { %v1402_v29 = vmul.f32 %v2244_v50, %v3143_v56  ;;  %v1406_v31 = vadd.f32 %v1405_v14, %v1391_v3  ;;  %v2248_v28 = vunpack.c.h.bf16 %v2344_v6  ;;  %v2251_v30 = vunpack.c.l.bf16 %v2345_v17 }
  0xdd   : >> { %v1343_v34 = vrot.slane %v1342_v18, 2  ;;  %v1356_v35 = vrot.slane %v1355_v21, 2  ;;  %v1419_v46 = vadd.f32 %v1418_v20, %v1399_v59  ;;  %v2252_v33 = vunpack.c.h.bf16 %v2345_v17  ;;  %v2348_v17 = vld [vmem:[%s3072_s26 + $0x900] sm:$0xff]  }
  0xde   : >> { %v1407_v39 = vadd.f32 %v1406_v31, %v1392_v61  ;;  %v2255_v40 = vunpack.c.l.bf16 %v2346_v23  ;;  %v2256_v43 = vunpack.c.h.bf16 %v2346_v23  ;;  %v1456_v41 = vmul.f32 %v2247_v22, %v3075_v1 }
  0xdf   : >> { %v1344_v47 = vadd.f32 %v1343_v34, %v1342_v18  ;;  %v1357_v42 = vadd.f32 %v1356_v35, %v1355_v21  ;;  %v1420_v48 = vadd.f32 %v1419_v46, %v1400_v10  ;;  %v1457_v38 = vmul.f32 %v2248_v28, %v3078_v2  ;;  %v2349_v46 = vld [vmem:[%s3072_s26 + $0x908] sm:$0xff]  }
  0xe0   : >> { %v1408_v49 = vadd.f32 %v1407_v39, %v1393_v9  ;;  %v1464_v45 = vmul.f32 %v2247_v22, %v3088_v11  ;;  %v1465_v50 = vmul.f32 %v2248_v28, %v3091_v12  ;;  %v2259_v54 = vunpack.c.l.bf16 %v2347_v44 }
  0xe1   : >> { %v1345_v52 = vrot.slane %v1344_v47, 1  ;;  %v1358_v53 = vrot.slane %v1357_v42, 1  ;;  %v1421_v51 = vadd.f32 %v1420_v48, %v1401_v24  ;;  %v2260_v57 = vunpack.c.h.bf16 %v2347_v44 }
  0xe2   : >> { %v1409_v55 = vadd.f32 %v1408_v49, %v1394_v62  ;;  %v1458_v58 = vmul.f32 %v2251_v30, %v3083_v5  ;;  %v1466_v63 = vmul.f32 %v2251_v30, %v3094_v13  ;;  %v1459_v6 = vmul.f32 %v2252_v33, %v3097_v15 }
  0xe3   : >> { %v1346_v3 = vadd.f32 %v1345_v52, %v1344_v47  ;;  %v1359_v61 = vadd.f32 %v1358_v53, %v1357_v42  ;;  %v1422_v4 = vadd.f32 %v1421_v51, %v1402_v29  ;;  %v1467_v8 = vmul.f32 %v2252_v33, %v3100_v16 }
  0xe4   : >> { %v1410_v7 = vrot.slane %v1409_v55, 4  ;;  %v1472_v59 = vadd.f32 %v1457_v38, %v1456_v41  ;;  %v1485_v60 = vadd.f32 %v1465_v50, %v1464_v45  ;;  %v1460_v10 = vmul.f32 %v2255_v40, %v3105_v19  ;;  %v2350_v45 = vld [vmem:[%s3072_s26 + $0x910] sm:$0xff]  }
  0xe5   : >> { %v1362_v9 = vsel %vm1154_vm0, %v1359_v61, %v1346_v3  ;;  %v1423_v62 = vrot.slane %v1422_v4, 4  ;;  %v1468_v14 = vmul.f32 %v2255_v40, %v3122_v32  ;;  %v1461_v24 = vmul.f32 %v2256_v43, %v3109_v25 }
  0xe6   : >> { %v1364_v18 = vadd.f32 %v1362_v9, %v1317_v0  ;;  %v1411_v21 = vadd.f32 %v1410_v7, %v1409_v55  ;;  %v1473_v20 = vadd.f32 %v1472_v59, %v1458_v58  ;;  %v1486_v22 = vadd.f32 %v1485_v60, %v1466_v63  ;;  %v2351_v58 = vld [vmem:[%s3072_s26 + $0x918] sm:$0xff]  }
  0xe7   : >> { %v1424_v23 = vadd.f32 %v1423_v62, %v1422_v4  ;;  %v1469_v29 = vmul.f32 %v2256_v43, %v3128_v36  ;;  %v2263_v35 = vunpack.c.l.bf16 %v2348_v17  ;;  %v1462_v39 = vmul.f32 %v2259_v54, %v3112_v26 }
  0xe8   : >> { %1365 = vst [vmem:[#allocation2 + $0x6] sm:$0x3] %v1364_v18  ;;  %v1412_v31 = vrot.slane %v1411_v21, 2  ;;  %v1474_v28 = vadd.f32 %v1473_v20, %v1459_v6  ;;  %v1487_v34 = vadd.f32 %v1486_v22, %v1467_v8  ;;  %v1463_v33 = vmul.f32 %v2260_v57, %v3115_v27  ;;  %v1386_v6 = vld [vmem:[#allocation2 + $0x8] sm:$0x3] }
  0xe9   : >> { %v1425_v30 = vrot.slane %v1424_v23, 2  ;;  %v2264_v40 = vunpack.c.h.bf16 %v2348_v17  ;;  %v1470_v47 = vmul.f32 %v2259_v54, %v3131_v37  ;;  %v1471_v41 = vmul.f32 %v2260_v57, %v3143_v56 }
  0xea   : >> { %v1413_v44 = vadd.f32 %v1412_v31, %v1411_v21  ;;  %v1475_v42 = vadd.f32 %v1474_v28, %v1460_v10  ;;  %v1488_v48 = vadd.f32 %v1487_v34, %v1468_v14  ;;  %v2267_v49 = vunpack.c.l.bf16 %v2349_v46  ;;  %v2352_v31 = vld [vmem:[%s3072_s26 + $0xa80] sm:$0xff]  }
  0xeb   : >> { %v1426_v43 = vadd.f32 %v1425_v30, %v1424_v23  ;;  %v2268_v38 = vunpack.c.h.bf16 %v2349_v46  ;;  %v1525_v51 = vmul.f32 %v2263_v35, %v3075_v1  ;;  %v1526_v63 = vmul.f32 %v2264_v40, %v3078_v2 }
  0xec   : >> { %v1414_v50 = vrot.slane %v1413_v44, 1  ;;  %v1476_v52 = vadd.f32 %v1475_v42, %v1461_v24  ;;  %v1489_v53 = vadd.f32 %v1488_v48, %v1469_v29  ;;  %v1533_v0 = vmul.f32 %v2263_v35, %v3088_v11 }
  0xed   : >> { %v1427_v55 = vrot.slane %v1426_v43, 1  ;;  %v1534_v54 = vmul.f32 %v2264_v40, %v3091_v12  ;;  %v2271_v57 = vunpack.c.l.bf16 %v2350_v45  ;;  %v2272_v8 = vunpack.c.h.bf16 %v2350_v45 }
  0xee   : >> { %v1415_v3 = vadd.f32 %v1414_v50, %v1413_v44  ;;  %v1477_v61 = vadd.f32 %v1476_v52, %v1462_v39  ;;  %v1490_v4 = vadd.f32 %v1489_v53, %v1470_v47  ;;  %v1527_v59 = vmul.f32 %v2267_v49, %v3083_v5 }
  0xef   : >> { %v1428_v7 = vadd.f32 %v1427_v55, %v1426_v43  ;;  %v1535_v60 = vmul.f32 %v2267_v49, %v3094_v13  ;;  %v2275_v10 = vunpack.c.l.bf16 %v2351_v58  ;;  %v1528_v14 = vmul.f32 %v2268_v38, %v3097_v15  ;;  %v2353_v43 = vld [vmem:[%s3072_s26 + $0xa88] sm:$0xff]  }
  0xf0   : >> { %v1478_v9 = vadd.f32 %v1477_v61, %v1463_v33  ;;  %v1491_v62 = vadd.f32 %v1490_v4, %v1471_v41  ;;  %v1536_v18 = vmul.f32 %v2268_v38, %v3100_v16  ;;  %v1541_v21 = vadd.f32 %v1526_v63, %v1525_v51 }
  0xf1   : >> { %v1431_v17 = vsel %vm1154_vm0, %v1428_v7, %v1415_v3  ;;  %v1554_v20 = vadd.f32 %v1534_v54, %v1533_v0  ;;  %v2276_v29 = vunpack.c.h.bf16 %v2351_v58  ;;  %v1529_v28 = vmul.f32 %v2271_v57, %v3105_v19  ;;  %v2354_v54 = vld [vmem:[%s3072_s26 + $0xa90] sm:$0xff]  }
  0xf2   : >> { %v1433_v22 = vadd.f32 %v1431_v17, %v1386_v6  ;;  %v1479_v23 = vrot.slane %v1478_v9, 4  ;;  %v1492_v24 = vrot.slane %v1491_v62, 4  ;;  %v1537_v34 = vmul.f32 %v2271_v57, %v3122_v32  ;;  %v1455_v17 = vld [vmem:[#allocation2 + $0xa] sm:$0x3] }
  0xf3   : >> { %v1542_v35 = vadd.f32 %v1541_v21, %v1527_v59  ;;  %v1555_v46 = vadd.f32 %v1554_v20, %v1535_v60  ;;  %v1530_v33 = vmul.f32 %v2272_v8, %v3109_v25  ;;  %v1538_v40 = vmul.f32 %v2272_v8, %v3128_v36  ;;  %v2355_v8 = vld [vmem:[%s3072_s26 + $0xa98] sm:$0xff]  }
  0xf4   : >> { %1434 = vst [vmem:[#allocation2 + $0x8] sm:$0x3] %v1433_v22  ;;  %v1480_v30 = vadd.f32 %v1479_v23, %v1478_v9  ;;  %v1493_v39 = vadd.f32 %v1492_v24, %v1491_v62  ;;  %v2279_v42 = vunpack.c.l.bf16 %v2352_v31  ;;  %v2280_v48 = vunpack.c.h.bf16 %v2352_v31 }
  0xf5   : >> { %v1543_v44 = vadd.f32 %v1542_v35, %v1528_v14  ;;  %v1556_v47 = vadd.f32 %v1555_v46, %v1536_v18  ;;  %v1531_v38 = vmul.f32 %v2275_v10, %v3112_v26  ;;  %v1532_v45 = vmul.f32 %v2276_v29, %v3115_v27 }
  0xf6   : >> { %v1481_v41 = vrot.slane %v1480_v30, 2  ;;  %v1494_v49 = vrot.slane %v1493_v39, 2  ;;  %v1539_v50 = vmul.f32 %v2275_v10, %v3131_v37  ;;  %v1540_v52 = vmul.f32 %v2276_v29, %v3143_v56 }
  0xf7   : >> { %v1544_v53 = vadd.f32 %v1543_v44, %v1529_v28  ;;  %v1557_v51 = vadd.f32 %v1556_v47, %v1537_v34  ;;  %v2283_v63 = vunpack.c.l.bf16 %v2353_v43  ;;  %v2284_v0 = vunpack.c.h.bf16 %v2353_v43  ;;  %v2356_v44 = vld [vmem:[%s3072_s26 + $0xc00] sm:$0xff]  }
  0xf8   : >> { %v1482_v55 = vadd.f32 %v1481_v41, %v1480_v30  ;;  %v1495_v58 = vadd.f32 %v1494_v49, %v1493_v39  ;;  %v1594_v4 = vmul.f32 %v2279_v42, %v3075_v1  ;;  %v1595_v57 = vmul.f32 %v2280_v48, %v3078_v2 }
  0xf9   : >> { %v1545_v3 = vadd.f32 %v1544_v53, %v1530_v33  ;;  %v1558_v61 = vadd.f32 %v1557_v51, %v1538_v40  ;;  %v1602_v59 = vmul.f32 %v2279_v42, %v3088_v11  ;;  %v1603_v60 = vmul.f32 %v2280_v48, %v3091_v12 }
  0xfa   : >> { %v1483_v6 = vrot.slane %v1482_v55, 1  ;;  %v1496_v7 = vrot.slane %v1495_v58, 1  ;;  %v2287_v10 = vunpack.c.l.bf16 %v2354_v54  ;;  %v2288_v14 = vunpack.c.h.bf16 %v2354_v54 }
  0xfb   : >> { %v1546_v9 = vadd.f32 %v1545_v3, %v1531_v38  ;;  %v1559_v62 = vadd.f32 %v1558_v61, %v1539_v50  ;;  %v1596_v20 = vmul.f32 %v2283_v63, %v3083_v5  ;;  %v1604_v22 = vmul.f32 %v2283_v63, %v3094_v13 }
  0xfc   : >> { %v1484_v18 = vadd.f32 %v1483_v6, %v1482_v55  ;;  %v1497_v21 = vadd.f32 %v1496_v7, %v1495_v58  ;;  %v2291_v29 = vunpack.c.l.bf16 %v2355_v8  ;;  %v1597_v31 = vmul.f32 %v2284_v0, %v3097_v15  ;;  %v2357_v55 = vld [vmem:[%s3072_s26 + $0xc08] sm:$0xff]  }
  0xfd   : >> { %v1547_v23 = vadd.f32 %v1546_v9, %v1532_v45  ;;  %v1560_v24 = vadd.f32 %v1559_v62, %v1540_v52  ;;  %v1605_v34 = vmul.f32 %v2284_v0, %v3100_v16  ;;  %v1610_v35 = vadd.f32 %v1595_v57, %v1594_v4 }
  0xfe   : >> { %v1500_v28 = vsel %vm1154_vm0, %v1497_v21, %v1484_v18  ;;  %v1623_v46 = vadd.f32 %v1603_v60, %v1602_v59  ;;  %v2292_v40 = vunpack.c.h.bf16 %v2355_v8  ;;  %v1598_v47 = vmul.f32 %v2287_v10, %v3105_v19  ;;  %v2358_v60 = vld [vmem:[%s3072_s26 + $0xc10] sm:$0xff]   ;;  %v2359_v21 = vld [vmem:[%s3072_s26 + $0xc18] sm:$0xff]  }
  0xff   : >> { %v1502_v30 = vadd.f32 %v1500_v28, %v1455_v17  ;;  %v1548_v39 = vrot.slane %v1547_v23, 4  ;;  %v1561_v33 = vrot.slane %v1560_v24, 4  ;;  %v1606_v42 = vmul.f32 %v2287_v10, %v3122_v32  ;;  %v1524_v28 = vld [vmem:[#allocation2 + $0xc] sm:$0x3] }
 0x100   : >> { %v1611_v48 = vadd.f32 %v1610_v35, %v1596_v20  ;;  %v1624_v43 = vadd.f32 %v1623_v46, %v1604_v22  ;;  %v1599_v38 = vmul.f32 %v2288_v14, %v3109_v25  ;;  %v1607_v45 = vmul.f32 %v2288_v14, %v3128_v36 }
 0x101   : >> { %1503 = vst [vmem:[#allocation2 + $0xa] sm:$0x3] %v1502_v30  ;;  %v1549_v41 = vadd.f32 %v1548_v39, %v1547_v23  ;;  %v1562_v49 = vadd.f32 %v1561_v33, %v1560_v24  ;;  %v2295_v53 = vunpack.c.l.bf16 %v2356_v44  ;;  %v2296_v51 = vunpack.c.h.bf16 %v2356_v44 }
 0x102   : >> { %v1612_v50 = vadd.f32 %v1611_v48, %v1597_v31  ;;  %v1625_v52 = vadd.f32 %v1624_v43, %v1605_v34  ;;  %v1600_v0 = vmul.f32 %v2291_v29, %v3112_v26  ;;  %v1601_v54 = vmul.f32 %v2292_v40, %v3115_v27 }
 0x103   : >> { %v1550_v58 = vrot.slane %v1549_v41, 2  ;;  %v1563_v63 = vrot.slane %v1562_v49, 2  ;;  %v1608_v3 = vmul.f32 %v2291_v29, %v3131_v37  ;;  %v1609_v61 = vmul.f32 %v2292_v40, %v3143_v56 }
 0x104   : >> { %v1613_v4 = vadd.f32 %v1612_v50, %v1598_v47  ;;  %v1626_v57 = vadd.f32 %v1625_v52, %v1606_v42  ;;  %v2299_v8 = vunpack.c.l.bf16 %v2357_v55  ;;  %v2300_v59 = vunpack.c.h.bf16 %v2357_v55 }
 0x105   : >> { %v1551_v6 = vadd.f32 %v1550_v58, %v1549_v41  ;;  %v1564_v7 = vadd.f32 %v1563_v63, %v1562_v49  ;;  %v1663_v10 = vmul.f32 %v2295_v53, %v3075_v1  ;;  %v1664_v14 = vmul.f32 %v2296_v51, %v3078_v2  ;;  %v2360_v41 = vld [vmem:[%s3072_s26 + $0xd80] sm:$0xff]   ;;  %v2361_v58 = vld [vmem:[%s3072_s26 + $0xd88] sm:$0xff]  }
 0x106   : >> { %v1614_v9 = vadd.f32 %v1613_v4, %v1599_v38  ;;  %v1627_v62 = vadd.f32 %v1626_v57, %v1607_v45  ;;  %v1671_v20 = vmul.f32 %v2295_v53, %v3088_v11  ;;  %v1672_v22 = vmul.f32 %v2296_v51, %v3091_v12 }
 0x107   : >> { %v1552_v17 = vrot.slane %v1551_v6, 1  ;;  %v1565_v18 = vrot.slane %v1564_v7, 1  ;;  %v2303_v29 = vunpack.c.l.bf16 %v2358_v60  ;;  %v2304_v31 = vunpack.c.h.bf16 %v2358_v60  ;;  %v2448_v60 = vld [vmem:[%s3069_s25] sm:$0xff] }
 0x108   : >> { %v1615_v23 = vadd.f32 %v1614_v9, %v1600_v0  ;;  %v1628_v24 = vadd.f32 %v1627_v62, %v1608_v3  ;;  %v1665_v46 = vmul.f32 %v2299_v8, %v3083_v5  ;;  %v1673_v1 = vmul.f32 %v2299_v8, %v3094_v13 }
 0x109   : >> { %v1553_v34 = vadd.f32 %v1552_v17, %v1551_v6  ;;  %v1566_v35 = vadd.f32 %v1565_v18, %v1564_v7  ;;  %v2307_v39 = vunpack.c.l.bf16 %v2359_v21  ;;  %v1666_v33 = vmul.f32 %v2300_v59, %v3097_v15  ;;  %v2362_v7 = vld [vmem:[%s3072_s26 + $0xd90] sm:$0xff]   ;;  %v2451_v17 = vld [vmem:[%s3069_s25 + $0x308] sm:$0xff] }
 0x10a   : >> { %v1616_v2 = vadd.f32 %v1615_v23, %v1601_v54  ;;  %v1629_v30 = vadd.f32 %v1628_v24, %v1609_v61  ;;  %v1674_v12 = vmul.f32 %v2300_v59, %v3100_v16  ;;  %v1679_v40 = vadd.f32 %v1664_v14, %v1663_v10  ;;  %v2450_v10 = vld [vmem:[%s3069_s25 + $0x300] sm:$0xff]  ;;  %v1593_v23 = vld [vmem:[#allocation2 + $0xe] sm:$0x3] }
 0x10b   : >> { %v1569_v11 = vsel %vm1154_vm0, %v1566_v35, %v1553_v34  ;;  %v1692_v44 = vadd.f32 %v1672_v22, %v1671_v20  ;;  %v2308_v43 = vunpack.c.h.bf16 %v2359_v21  ;;  %v1667_v5 = vmul.f32 %v2303_v29, %v3105_v19  ;;  %v2453_v35 = vld [vmem:[%s3069_s25 + $0x310] sm:$0xff] }
 0x10c   : >> { %v1571_v47 = vadd.f32 %v1569_v11, %v1524_v28  ;;  %v1617_v42 = vrot.slane %v1616_v2, 4  ;;  %v1630_v48 = vrot.slane %v1629_v30, 4  ;;  %v1675_v13 = vmul.f32 %v2303_v29, %v3122_v32  ;;  %v2452_v28 = vld [vmem:[%s3069_s25 + $0x10] sm:$0xff] }
 0x10d   : >> { %v1680_v49 = vadd.f32 %v1679_v40, %v1665_v46  ;;  %v1693_v38 = vadd.f32 %v1692_v44, %v1673_v1  ;;  %v1668_v50 = vmul.f32 %v2304_v31, %v3109_v25  ;;  %v1676_v16 = vmul.f32 %v2304_v31, %v3128_v36  ;;  %v2363_v31 = vld [vmem:[%s3072_s26 + $0xd98] sm:$0xff]  }
 0x10e   : >> { %1572 = vst [vmem:[#allocation2 + $0xc] sm:$0x3] %v1571_v47  ;;  %v1618_v15 = vadd.f32 %v1617_v42, %v1616_v2  ;;  %v1631_v45 = vadd.f32 %v1630_v48, %v1629_v30  ;;  %v2311_v51 = vunpack.c.l.bf16 %v2360_v41  ;;  %v2312_v55 = vunpack.c.h.bf16 %v2360_v41 }
 0x10f   : >> { %v1681_v52 = vadd.f32 %v1680_v49, %v1666_v33  ;;  %v1694_v53 = vadd.f32 %v1693_v38, %v1674_v12  ;;  %v1669_v32 = vmul.f32 %v2307_v39, %v3112_v26  ;;  %v1670_v0 = vmul.f32 %v2308_v43, %v3115_v27  ;;  %v2449_v27 = vld [vmem:[%s3069_s25 + $0x8] sm:$0xff]  ;;  %v2455_v12 = vld [vmem:[%s3069_s25 + $0x318] sm:$0xff]  ;;  %v2457_v49 = vld [vmem:[%s3069_s25 + $0x320] sm:$0xff] }
 0x110   : >> { %v1619_v63 = vrot.slane %v1618_v15, 2  ;;  %v1632_v19 = vrot.slane %v1631_v45, 2  ;;  %v1677_v54 = vmul.f32 %v2307_v39, %v3131_v37  ;;  %v1678_v25 = vmul.f32 %v2308_v43, %v3143_v56  ;;  %v2454_v39 = vld [vmem:[%s3069_s25 + $0x18] sm:$0xff] }
 0x111   : >> { %v1682_v36 = vadd.f32 %v1681_v52, %v1667_v5  ;;  %v1695_v3 = vadd.f32 %v1694_v53, %v1675_v13  ;;  %v2315_v57 = vunpack.c.l.bf16 %v2361_v58  ;;  %v2316_v6 = vunpack.c.h.bf16 %v2361_v58  ;;  %v2456_v5 = vld [vmem:[%s3069_s25 + $0x20] sm:$0xff]  ;;  %v2458_v53 = vld [vmem:[%s3069_s25 + $0x28] sm:$0xff] }
 0x112   : >> { %v1620_v61 = vadd.f32 %v1619_v63, %v1618_v15  ;;  %v1633_v4 = vadd.f32 %v1632_v19, %v1631_v45  ;;  %v1732_v26 = vmul.f32 %v2448_v60, %v2311_v51  ;;  %v1733_v9 = vmul.f32 %v2449_v27, %v2312_v55 }
 0x113   : >> { %v1683_v8 = vadd.f32 %v1682_v36, %v1668_v50  ;;  %v1696_v59 = vadd.f32 %v1695_v3, %v1676_v16  ;;  %v1740_v14 = vmul.f32 %v2450_v10, %v2311_v51  ;;  %v1741_v18 = vmul.f32 %v2451_v17, %v2312_v55  ;;  %v2459_v55 = vld [vmem:[%s3069_s25 + $0x328] sm:$0xff]  ;;  %v2461_v36 = vld [vmem:[%s3069_s25 + $0x330] sm:$0xff] }
 0x114   : >> { %v1621_v37 = vrot.slane %v1620_v61, 1  ;;  %v1634_v62 = vrot.slane %v1633_v4, 1  ;;  %v2319_v22 = vunpack.c.l.bf16 %v2362_v7  ;;  %v1734_v34 = vmul.f32 %v2452_v28, %v2315_v57  ;;  %v1662_v10 = vld [vmem:[#allocation2 + $0x10] sm:$0x3] }
 0x115   : >> { %v1684_v21 = vadd.f32 %v1683_v8, %v1669_v32  ;;  %v1697_v20 = vadd.f32 %v1696_v59, %v1677_v54  ;;  %v1742_v46 = vmul.f32 %v2453_v35, %v2315_v57  ;;  %v2320_v30 = vunpack.c.h.bf16 %v2362_v7  ;;  %v2460_v54 = vld [vmem:[%s3069_s25 + $0x30] sm:$0xff]  ;;  %v2462_v7 = vld [vmem:[%s3069_s25 + $0x38] sm:$0xff] }
 0x116   : >> { %v1622_v24 = vadd.f32 %v1621_v37, %v1620_v61  ;;  %v1635_v29 = vadd.f32 %v1634_v62, %v1633_v4  ;;  %v1735_v33 = vmul.f32 %v2454_v39, %v2316_v6  ;;  %v1743_v40 = vmul.f32 %v2455_v12, %v2316_v6 }
 0x117   : >> { %v1685_v1 = vadd.f32 %v1684_v21, %v1670_v0  ;;  %v1698_v2 = vadd.f32 %v1697_v20, %v1678_v25  ;;  %v1748_v44 = vadd.f32 %v1733_v9, %v1732_v26  ;;  %v1761_v47 = vadd.f32 %v1741_v18, %v1740_v14 }
 0x118   : >> { %v1638_v11 = vsel %vm1154_vm0, %v1635_v29, %v1622_v24  ;;  %v2323_v41 = vunpack.c.l.bf16 %v2363_v31  ;;  %v1736_v13 = vmul.f32 %v2456_v5, %v2319_v22  ;;  %v1744_v38 = vmul.f32 %v2457_v49, %v2319_v22 }
 0x119   : >> { %v1640_v42 = vadd.f32 %v1638_v11, %v1593_v23  ;;  %v1686_v48 = vrot.slane %v1685_v1, 4  ;;  %v1699_v43 = vrot.slane %v1698_v2, 4  ;;  %v1749_v15 = vadd.f32 %v1748_v44, %v1734_v34 }
 0x11a   : >> { %v1762_v45 = vadd.f32 %v1761_v47, %v1742_v46  ;;  %v2324_v52 = vunpack.c.h.bf16 %v2363_v31  ;;  %v1737_v51 = vmul.f32 %v2458_v53, %v2320_v30  ;;  %v1745_v58 = vmul.f32 %v2459_v55, %v2320_v30 }
 0x11b   : >> { %1641 = vst [vmem:[#allocation2 + $0xe] sm:$0x3] %v1640_v42  ;;  %v1687_v50 = vadd.f32 %v1686_v48, %v1685_v1  ;;  %v1700_v16 = vadd.f32 %v1699_v43, %v1698_v2  ;;  %v1750_v63 = vadd.f32 %v1749_v15, %v1735_v33  ;;  %v1738_v25 = vmul.f32 %v2460_v54, %v2323_v41  ;;  %v1731_v2 = vld [vmem:[#allocation2 + $0x12] sm:$0x3] }
 0x11c   : >> { %v1763_v19 = vadd.f32 %v1762_v45, %v1743_v40  ;;  %v1746_v3 = vmul.f32 %v2461_v36, %v2323_v41  ;;  %v1739_v8 = vmul.f32 %v2462_v7, %v2324_v52  ;;  %v1747_v59 = vmul.f32 %v2324_v52, %v3143_v56 }
 0x11d   : >> { %v1688_v32 = vrot.slane %v1687_v50, 2  ;;  %v1701_v0 = vrot.slane %v1700_v16, 2  ;;  %v1751_v61 = vadd.f32 %v1750_v63, %v1736_v13 }
 0x11e   : >> { %v1764_v4 = vadd.f32 %v1763_v19, %v1744_v38 }
 0x11f   : >> { %v1689_v57 = vadd.f32 %v1688_v32, %v1687_v50  ;;  %v1702_v6 = vadd.f32 %v1701_v0, %v1700_v16  ;;  %v1752_v60 = vadd.f32 %v1751_v61, %v1737_v51 }
 0x120   : >> { %v1765_v26 = vadd.f32 %v1764_v4, %v1745_v58 }
 0x121   : >> { %v1690_v27 = vrot.slane %v1689_v57, 1  ;;  %v1703_v9 = vrot.slane %v1702_v6, 1  ;;  %v1753_v37 = vadd.f32 %v1752_v60, %v1738_v25 }
 0x122   : >> { %v1766_v62 = vadd.f32 %v1765_v26, %v1746_v3 }
 0x123   : >> { %v1691_v14 = vadd.f32 %v1690_v27, %v1689_v57  ;;  %v1704_v17 = vadd.f32 %v1703_v9, %v1702_v6  ;;  %v1754_v18 = vadd.f32 %v1753_v37, %v1739_v8 }
 0x124   : >> { %v1767_v21 = vadd.f32 %v1766_v62, %v1747_v59 }
 0x125   : >> { %v1707_v20 = vsel %vm1154_vm0, %v1704_v17, %v1691_v14  ;;  %v1755_v23 = vrot.slane %v1754_v18, 4 }
 0x126   : >> { %v1709_v22 = vadd.f32 %v1707_v20, %v1662_v10  ;;  %v1768_v24 = vrot.slane %v1767_v21, 4 }
 0x127   : >> { %v1756_v29 = vadd.f32 %v1755_v23, %v1754_v18 }
 0x128   : >> { %1710 = vst [vmem:[#allocation2 + $0x10] sm:$0x3] %v1709_v22  ;;  %v1769_v31 = vadd.f32 %v1768_v24, %v1767_v21 }
 0x129   : >> { %v1757_v56 = vrot.slane %v1756_v29, 2 }
 0x12a   : >> { %v1770_v28 = vrot.slane %v1769_v31, 2 }
 0x12b   : >> { %v1758_v34 = vadd.f32 %v1757_v56, %v1756_v29 }
 0x12c   : >> { %v1771_v35 = vadd.f32 %v1770_v28, %v1769_v31 }
 0x12d   : >> { %v1759_v46 = vrot.slane %v1758_v34, 1 }
 0x12e   : >> { %v1772_v1 = vrot.slane %v1771_v35, 1 }
 0x12f   : >> { %v1760_v30 = vadd.f32 %v1759_v46, %v1758_v34  ;;  %1069 = sbr.rel (!%p1067_p13) target bundleno = 158 (0x9e), region = 155 }
 0x130   : >> { %v1773_v39 = vadd.f32 %v1772_v1, %v1771_v35 }
 0x132   : >> { %v1776_v33 = vsel %vm1154_vm0, %v1773_v39, %v1760_v30 }
 0x133   : >> { %v1778_v11 = vadd.f32 %v1776_v33, %v1731_v2 }
 0x135   : >> { %1779 = vst [vmem:[#allocation2 + $0x12] sm:$0x3] %v1778_v11 }
 0x136   : > { %1783 = sbr.rel (%p2157_p0) target bundleno = 602 (0x25a), region = 89  ;;  %v1784_v12 = vld [vmem:[#allocation2] sm:$0x3] (!%p2157_p0)  ;;  %vm1794_vm1 = vcmask (!%p2157_p0), 1041408   ;;  %v1786_v40 = vld [vmem:[#allocation2 + $0x4] sm:$0x3] (!%p2157_p0)  ;;  %v1841_v58 = vlaneseq (!%p2157_p0) }
 0x137   : > { %v1795_v44 = vsel (!%p2157_p0), %vm1794_vm1, %v1784_v12, 0.0  ;;  %v1801_v47 = vsel (!%p2157_p0), %vm1794_vm1, %v1786_v40, 0.0  ;;  %v1785_v42 = vld [vmem:[#allocation2 + $0x2] sm:$0x3] (!%p2157_p0)  ;;  %v1787_v48 = vld [vmem:[#allocation2 + $0x6] sm:$0x3] (!%p2157_p0) }
 0x138   : > { %1796 = vadd.xlane.f32.xlu0 (!%p2157_p0), %v1795_v44  ;;  %1802 = vadd.xlane.f32.xlu1 (!%p2157_p0), %v1801_v47  ;;  %v1798_v43 = vsel (!%p2157_p0), %vm1794_vm1, %v1785_v42, 0.0  ;;  %v1804_v41 = vsel (!%p2157_p0), %vm1794_vm1, %v1787_v48, 0.0  ;;  %v1788_v5 = vld [vmem:[#allocation2 + $0x8] sm:$0x3] (!%p2157_p0)  ;;  %v1789_v13 = vld [vmem:[#allocation2 + $0xa] sm:$0x3] (!%p2157_p0) }
 0x139   : > { %v1807_v49 = vsel (!%p2157_p0), %vm1794_vm1, %v1788_v5, 0.0  ;;  %v1810_v38 = vsel (!%p2157_p0), %vm1794_vm1, %v1789_v13, 0.0  ;;  %v1790_v15 = vld [vmem:[#allocation2 + $0xc] sm:$0x3] (!%p2157_p0)  ;;  %v1791_v45 = vld [vmem:[#allocation2 + $0xe] sm:$0x3] (!%p2157_p0) }
 0x13a   : > { %v1813_v50 = vsel (!%p2157_p0), %vm1794_vm1, %v1790_v15, 0.0  ;;  %v1816_v16 = vsel (!%p2157_p0), %vm1794_vm1, %v1791_v45, 0.0  ;;  %v1792_v53 = vld [vmem:[#allocation2 + $0x10] sm:$0x3] (!%p2157_p0)  ;;  %v1842_v63 = vand.u32 (!%p2157_p0), 127, %v1841_v58  ;;  %v1844_v19 = vshrl.u32 (!%p2157_p0), %v1841_v58, 7 }
 0x13b   : > { %v1819_v55 = vsel (!%p2157_p0), %vm1794_vm1, %v1792_v53, 0.0  ;;  %vm1885_vm2 = vcmask (!%p2157_p0), 1042434   ;;  %vm1887_vm3 = vcmask (!%p2157_p0), 1043459   ;;  %vm1889_vm4 = vcmask (!%p2157_p0), 1044484   ;;  %v2158_v31 = vld [vmem:[%s3403_s2] ss:$0 sm:$0xff] (!%p2157_p0) }
 0x13c   : > { %1799 = vadd.xlane.f32.xlu0 (!%p2157_p0), %v1798_v43  ;;  %1805 = vadd.xlane.f32.xlu1 (!%p2157_p0), %v1804_v41  ;;  %v1793_v52 = vld [vmem:[#allocation2 + $0x12] sm:$0x3] (!%p2157_p0)  ;;  %v1845_v54 = vsub.s32 (!%p2157_p0), %v1842_v63, %v1844_v19  ;;  %vm1891_vm5 = vcmask (!%p2157_p0), 1045509   ;;  %vm1893_vm6 = vcmask (!%p2157_p0), 1046534   ;;  %vm1895_vm7 = vcmask (!%p2157_p0), 1047559  }
 0x13d   : > { %v1822_v51 = vsel %vm1794_vm1, %v1793_v52, 0.0  ;;  %vm1939_vm8 = vcmask 74752  }
 0x140   : > { %1808 = vadd.xlane.f32.xlu0 %v1807_v49  ;;  %1811 = vadd.xlane.f32.xlu1 %v1810_v38 }
 0x144   : > { %1814 = vadd.xlane.f32.xlu0 %v1813_v50  ;;  %1817 = vadd.xlane.f32.xlu1 %v1816_v16 }
 0x148   : > { %1823 = vadd.xlane.f32.xlu1 %v1822_v51  ;;  %1820 = vadd.xlane.f32.xlu0 %v1819_v55 }
 0x1c5   : > { %v1797_v32 = vpop.xlane.xlu0 %1796  ;;  %v1803_v0 = vpop.xlane.xlu1 %1802 }
 0x1c6   : > { %v1846_v3 = vrot.slane %v1797_v32, %v1845_v54  ;;  %v1854_v57 = vrot.slane %v1803_v0, %v1845_v54 }
 0x1c9   : > { %v1800_v25 = vpop.xlane.xlu0 %1799  ;;  %v1806_v36 = vpop.xlane.xlu1 %1805 }
 0x1ca   : > { %v1850_v61 = vrot.slane %v1800_v25, %v1845_v54  ;;  %v1858_v4 = vrot.slane %v1806_v36, %v1845_v54 }
 0x1cc   : > { %v1884_v6 = vsel %vm1154_vm0, %v1850_v61, %v1846_v3 }
 0x1cd   : > { %v1886_v7 = vsel %vm1885_vm2, %v1854_v57, %v1884_v6  ;;  %v1809_v8 = vpop.xlane.xlu0 %1808  ;;  %v1812_v59 = vpop.xlane.xlu1 %1811 }
 0x1ce   : > { %v1888_v60 = vsel %vm1887_vm3, %v1858_v4, %v1886_v7  ;;  %v1862_v26 = vrot.slane %v1809_v8, %v1845_v54  ;;  %v1866_v27 = vrot.slane %v1812_v59, %v1845_v54 }
 0x1d0   : > { %v1890_v9 = vsel %vm1889_vm4, %v1862_v26, %v1888_v60 }
 0x1d1   : > { %v1815_v37 = vpop.xlane.xlu0 %1814  ;;  %v1818_v62 = vpop.xlane.xlu1 %1817  ;;  %v1892_v17 = vsel %vm1891_vm5, %v1866_v27, %v1890_v9 }
 0x1d2   : > { %v1870_v10 = vrot.slane %v1815_v37, %v1845_v54  ;;  %v1874_v14 = vrot.slane %v1818_v62, %v1845_v54 }
 0x1d4   : > { %v1894_v18 = vsel %vm1893_vm6, %v1870_v10, %v1892_v17 }
 0x1d5   : > { %v1824_v21 = vpop.xlane.xlu1 %1823  ;;  %v1896_v20 = vsel %vm1895_vm7, %v1874_v14, %v1894_v18  ;;  %v1821_v22 = vpop.xlane.xlu0 %1820 }
 0x1d6   : > { %v1882_v23 = vrot.slane %v1824_v21, %v1845_v54  ;;  %1900 = vxpose.xlu0.b32.start [1/2] (short) (narrow) %v1896_v20, 8  ;;  %v1878_v24 = vrot.slane %v1821_v22, %v1845_v54 }
 0x1d8   : > { %v1897_v29 = vsel %vm1154_vm0, %v1882_v23, %v1878_v24 }
 0x1da   : > { %1901 = vxpose.xlu0.b32.end [2/2] (short) (narrow) %v1897_v29, 8 }
 0x256   : > { %v1916_v56 = vpop.trf.xlu0 }
 0x257   : > { %v1938_v28 = vadd.f32 %v2158_v31, %v1916_v56 }
 0x259   : > { %1940 = vst.msk [vmem:[#allocation7] sm:$0x3] %vm1939_vm8, %v1938_v28 }
 0x25a PF: > { %p3357_p1 = scmp.eq.s32.totalorder %s2065_s18, 1  ;;  %s2560_s29 = smov [#allocation7]  }
 0x25b   : > { %s1948_s30 = sshll.u32 %s2560_s29, 4  ;;  %s1949_s30 = int_to_ptr.vmem [resolvable:$true] %s1948_s30 }
 0x25c   : > { %s2463_s4 = scalar_lea.vmem %s1949_s30, 32  ;;  %p2470_p5 = scmp.lt.s32.totalorder %s1949_s30, %s1949_s30 }
 0x25d   : > { %p2464_p2 = scmp.ne.s32.totalorder %s1949_s30, %s2463_s4  ;;  %p2471_p6 = scmp.lt.s32.totalorder %s2463_s4, %s2463_s4 }
 0x25f   : > { %p2465_p3 = pnand %p2464_p2, %p3357_p1  ;;  %p2472_p7 = por %p2471_p6, %p2470_p5 }
 0x261   : > { %p2466_p4 = pneg %p2465_p3 }
 0x263   : > { %p2473_p8 = pnand %p2472_p7, %p2466_p4 }
 0x265   : > { %2476 = shalt.err (!%p2473_p8)
}
 0x266   : > { %s2477_s18 = scalar_lea.hbm %s3404_s3, 32 }
 0x267   : > { %p2478_p9 = scmp.ne.s32.totalorder %s3404_s3, %s2477_s18  ;;  %p2483_p12 = scmp.lt.u32.totalorder %s2477_s18, %s3404_s3 }
 0x269   : > { %p2479_p10 = pnand %p2478_p9, %p3357_p1 }
 0x26b   : > { %p2480_p11 = pneg %p2479_p10 }
 0x26d   : > { %p2485_p13 = pnand %p2483_p12, %p2480_p11 }
 0x26f   : > { %2488 = shalt.err (!%p2485_p13)
}
 0x270   : > { %2378 = dma.vmem_to_hbm [thread:$0]  (%p3357_p1), %s1949_s30, 32, %s3404_s3, [#allocation6]  }
 0x271   : > { %2522 = dma.done.wait (%p3357_p1), [#allocation6], 32  }
 0x272   : > { %2524 = vsyncadd (%p3357_p1), [#allocation6], 4294967264 }
 0x273 PF: > { %s17_s17 = sadd.s32 1, %s2547_s17   ;;  %s3408_s12 = smov %s2531_s13 }
 0x274   : > { %p14_p0 = scmp.ge.s32.totalorder %s17_s17, 4   ;;  %s3409_s13 = smov %s2535_s14 }
 0x275   : > { %s3410_s14 = smov %s2631_s24  ;;  %s3411_s15 = smov %s2543_s16 }
 0x276   : > { %s3412_s16 = smov %s3414_s19  ;;  %16 = sbr.rel (!%p14_p0) target bundleno = 5 (0x5), region = 166 }
 0x27d   :  { %1961 = vsyncpa [#allocation5], 1 }
 0x27e   :  { %1963 = vsyncpa [#allocation5 + $0x1], 1 }
 0x27f   :  { %1964 = vsyncpa [#allocation6], 1 }
 0x280   :  { %1966 = vsyncpa [#allocation6 + $0x1], 1 }

</bundles_post_ra>
